<compile_context>
chip_gen: v7x
topology: tpu7x:2x2x1
jax: 0.10.0
libtpu: 0.0.40
codegen_flags: <defaults>
</compile_context>

<pallas_src>
import math

import jax
import jax.numpy as jnp
from jax.experimental import pallas as pl
from jax.experimental.pallas import tpu as pltpu


def churn_mlp_kernel(x_ref,
                     w1_ref, b1_ref,
                     w2_ref, b2_ref,
                     w3_ref, b3_ref,
                     w4_ref, b4_ref,
                     w5t_ref, b5_ref,
                     o_ref):
    """Fused 5-layer MLP: (Linear + LeakyReLU(0.01)) x4 -> Linear -> Sigmoid.

    x_ref:    (tile_b, D)  f32  activations (batch on sublanes, feats on lanes)
    w{i}_ref: (in, out)    f32  VMEM-resident across all grid steps
    b{i}_ref: (1, out)     f32
    w5t_ref:  (1, 32)      f32  final layer, stored pre-transposed
    b5_ref:   (1, 1)       f32
    o_ref:    (1, tile_b)  f32  per-row probability, lane-dense along batch
    """

    def layer(h, w_ref, b_ref):
        # MXU matmul with f32 accumulation; bias add on the VPU.
        return jnp.dot(h, w_ref[...], preferred_element_type=jnp.float32) + b_ref[...]

    def leaky_relu(v):
        # single VPU max instead of compare + select
        return jnp.maximum(v, 0.01 * v)

    h = x_ref[...]                                   # (tile_b, D), already f32
    h = leaky_relu(layer(h, w1_ref, b1_ref))         # (tile_b, 256)
    h = leaky_relu(layer(h, w2_ref, b2_ref))         # (tile_b, 128)
    h = leaky_relu(layer(h, w3_ref, b3_ref))         # (tile_b, 64)
    h = leaky_relu(layer(h, w4_ref, b4_ref))         # (tile_b, 32)

    # Final 32 -> 1 layer as (1,32) contracted with (tile_b,32) on its last dim
    # (i.e. lhs @ rhs.T on the MXU): the result is (1, tile_b), so the per-row
    # scalar is lane-dense along the batch axis -> unmasked stores and only
    # 4 B/row of HBM writeback.
    y = jax.lax.dot_general(
        w5t_ref[...], h,
        dimension_numbers=(((1,), (1,)), ((), ())),
        preferred_element_type=jnp.float32)           # (1, tile_b)
    y = y + b5_ref[...]                               # (1,1) broadcast

    # Exact sigmoid (EUP exp + exact reciprocal): output tile is tiny, EUP has
    # slack, and this keeps probabilities calibrated (review correctness note).
    o_ref[...] = 1.0 / (1.0 + jnp.exp(-y))


def _choose_tile_b(B, tile_b):
    """Batch-tile policy: large tiles (amortize per-step overhead), multiple of
    128 (lane-dense output), no over-padding of tiny batches, and at least two
    evenly sized tiles for medium/large batches so v7x can use both TCs."""
    tile_b = max(128, (min(int(tile_b), 4096) // 128) * 128)
    tile_b = min(tile_b, pl.cdiv(B, 128) * 128)           # don't over-pad small B
    if B >= 2 * 128:
        # guarantee >= 2 evenly sized grid steps (v7x megacore sharding)
        tile_b = min(tile_b, pl.cdiv(pl.cdiv(B, 2), 128) * 128)
    return tile_b


def churn_predict_forward(x, params, *, tile_b=2048):
    """x: (B, input_dim) f32.  params: w1..w5 f32 (in, out), b1..b5 f32 (1, out)."""
    B, D = x.shape

    tile_b = _choose_tile_b(B, tile_b)
    b_pad = pl.cdiv(B, tile_b) * tile_b
    if b_pad != B:
        x = jnp.pad(x, ((0, b_pad - B), (0, 0)))
    grid = (b_pad // tile_b,)

    w5t = params["w5"].T                                   # (1, 32), tiny

    resident = lambda i: (0, 0)   # same block every step -> stays VMEM-resident
    in_specs = [
        pl.BlockSpec((tile_b, D), lambda i: (i, 0)),       # x tile (pipelined)
        pl.BlockSpec(params["w1"].shape, resident),
        pl.BlockSpec(params["b1"].shape, resident),
        pl.BlockSpec(params["w2"].shape, resident),
        pl.BlockSpec(params["b2"].shape, resident),
        pl.BlockSpec(params["w3"].shape, resident),
        pl.BlockSpec(params["b3"].shape, resident),
        pl.BlockSpec(params["w4"].shape, resident),
        pl.BlockSpec(params["b4"].shape, resident),
        pl.BlockSpec(w5t.shape, resident),
        pl.BlockSpec(params["b5"].shape, resident),
    ]

    out = pl.pallas_call(
        churn_mlp_kernel,
        out_shape=jax.ShapeDtypeStruct((1, b_pad), jnp.float32),
        grid=grid,
        in_specs=in_specs,
        out_specs=pl.BlockSpec((1, tile_b), lambda i: (0, i)),   # lane-dense row
        compiler_params=pltpu.CompilerParams(
            dimension_semantics=("parallel",),     # shard batch tiles on v7x
            vmem_limit_bytes=32 * 1024 * 1024),    # headroom on v5e's 16 MiB default
    )(x,
      params["w1"], params["b1"],
      params["w2"], params["b2"],
      params["w3"], params["b3"],
      params["w4"], params["b4"],
      w5t, params["b5"])

    return out[0, :B].reshape(B, 1)


def kaiming_uniform(key, fan_in, fan_out, gain):
    # torch.nn.init.kaiming_uniform_: bound = gain * sqrt(3 / fan_in);
    # torch weight shape is (out, in), we store it transposed as (in, out).
    bound = gain * math.sqrt(3.0 / fan_in)
    return jax.random.uniform(key, (fan_in, fan_out), jnp.float32, -bound, bound)


def linear_bias(key, fan_in, fan_out):
    # nn.Linear default bias init: U(-1/sqrt(fan_in), 1/sqrt(fan_in)).
    bound = 1.0 / math.sqrt(fan_in)
    return jax.random.uniform(key, (1, fan_out), jnp.float32, -bound, bound)


def init_params(key, input_dimension):
    dims = [input_dimension, 256, 128, 64, 32, 1]
    # Layers 1-4: kaiming_uniform_ default (leaky_relu, a=0) -> gain sqrt(2);
    # layer 5: nonlinearity='sigmoid' -> gain 1.0.
    gains = [math.sqrt(2.0)] * 4 + [1.0]
    params = {}
    keys = jax.random.split(key, 10)
    for i in range(5):
        fan_in, fan_out = dims[i], dims[i + 1]
        params[f"w{i+1}"] = kaiming_uniform(keys[2 * i], fan_in, fan_out, gains[i])
        params[f"b{i+1}"] = linear_bias(keys[2 * i + 1], fan_in, fan_out)
    return params


if __name__ == "__main__":
    input_dimension = 20   # number of churn features after bool->int cast
    batch = 300            # -> tile_b=256, grid=(2,): exercises padding, multi-tile, parallel

    key = jax.random.PRNGKey(0)
    k_params, k_x = jax.random.split(key)
    params = init_params(k_params, input_dimension)
    x = jax.random.normal(k_x, (batch, input_dimension), jnp.float32)

    out = churn_predict_forward(x, params)
    out = jax.block_until_ready(out)

    # Pure-JAX f32 reference with identical math.
    def ref_forward(x, p):
        h = x
        for i in range(1, 5):
            h = jnp.dot(h, p[f"w{i}"], preferred_element_type=jnp.float32) + p[f"b{i}"]
            h = jnp.maximum(h, 0.01 * h)
        h = jnp.dot(h, p["w5"], preferred_element_type=jnp.float32) + p["b5"]
        return jax.nn.sigmoid(h)

    ref = ref_forward(x, params)
    assert out.shape == (batch, 1), out.shape
    assert jnp.allclose(out, ref, atol=2e-3, rtol=2e-3), \
        float(jnp.max(jnp.abs(out - ref)))

    print("KERNEL_OK")
</pallas_src>

<mosaic_0001>
module attributes {stable_mosaic.version = 11 : i64} {
  func.func @churn_mlp_kernel(%arg0: i32, %arg1: memref<256x20xf32, #tpu.memory_space<vmem>>, %arg2: memref<20x256xf32, #tpu.memory_space<vmem>>, %arg3: memref<1x256xf32, #tpu.memory_space<vmem>>, %arg4: memref<256x128xf32, #tpu.memory_space<vmem>>, %arg5: memref<1x128xf32, #tpu.memory_space<vmem>>, %arg6: memref<128x64xf32, #tpu.memory_space<vmem>>, %arg7: memref<1x64xf32, #tpu.memory_space<vmem>>, %arg8: memref<64x32xf32, #tpu.memory_space<vmem>>, %arg9: memref<1x32xf32, #tpu.memory_space<vmem>>, %arg10: memref<1x32xf32, #tpu.memory_space<vmem>>, %arg11: memref<1x1xf32, #tpu.memory_space<vmem>>, %arg12: memref<1x256xf32, #tpu.memory_space<vmem>>) attributes {dimension_semantics = [#tpu.dimension_semantics<parallel>], iteration_bounds = array<i64: 2>, scalar_prefetch = 0 : i64, scratch_operands = 0 : i64, tpu.core_type = #tpu.core_type<tc>, window_params = [{transform_indices = @transform_0, window_bounds = array<i64: 256, 20>}, {pipeline_mode = #tpu.pipeline_mode<synchronous>, transform_indices = @transform_1, window_bounds = array<i64: 20, 256>}, {pipeline_mode = #tpu.pipeline_mode<synchronous>, transform_indices = @transform_2, window_bounds = array<i64: 1, 256>}, {pipeline_mode = #tpu.pipeline_mode<synchronous>, transform_indices = @transform_3, window_bounds = array<i64: 256, 128>}, {pipeline_mode = #tpu.pipeline_mode<synchronous>, transform_indices = @transform_4, window_bounds = array<i64: 1, 128>}, {pipeline_mode = #tpu.pipeline_mode<synchronous>, transform_indices = @transform_5, window_bounds = array<i64: 128, 64>}, {pipeline_mode = #tpu.pipeline_mode<synchronous>, transform_indices = @transform_6, window_bounds = array<i64: 1, 64>}, {pipeline_mode = #tpu.pipeline_mode<synchronous>, transform_indices = @transform_7, window_bounds = array<i64: 64, 32>}, {pipeline_mode = #tpu.pipeline_mode<synchronous>, transform_indices = @transform_8, window_bounds = array<i64: 1, 32>}, {pipeline_mode = #tpu.pipeline_mode<synchronous>, transform_indices = @transform_9, window_bounds = array<i64: 1, 32>}, {pipeline_mode = #tpu.pipeline_mode<synchronous>, transform_indices = @transform_10, window_bounds = array<i64: 1, 1>}, {transform_indices = @transform_11, window_bounds = array<i64: 1, 256>}]} {
    %c0 = arith.constant 0 : index
    %c0_0 = arith.constant 0 : index
    %0 = vector.load %arg1[%c0, %c0_0] : memref<256x20xf32, #tpu.memory_space<vmem>>, vector<256x20xf32>
    %c0_1 = arith.constant 0 : index
    %c0_2 = arith.constant 0 : index
    %1 = vector.load %arg2[%c0_1, %c0_2] : memref<20x256xf32, #tpu.memory_space<vmem>>, vector<20x256xf32>
    %cst = arith.constant dense<0.000000e+00> : vector<256x256xf32>
    %2 = tpu.matmul %0, %1, %cst {dimension_numbers = #tpu.dot_dimension_numbers<[1], [0], [0], [1], [0, 0, 1, 1], [], []>} : vector<256x20xf32>, vector<20x256xf32>, vector<256x256xf32> -> vector<256x256xf32>
    %c0_3 = arith.constant 0 : index
    %c0_4 = arith.constant 0 : index
    %3 = vector.load %arg3[%c0_3, %c0_4] : memref<1x256xf32, #tpu.memory_space<vmem>>, vector<1x256xf32>
    %4 = vector.broadcast %3 : vector<1x256xf32> to vector<256x256xf32>
    %5 = arith.addf %2, %4 : vector<256x256xf32>
    %cst_5 = arith.constant 0.00999999977 : f32
    %6 = vector.broadcast %cst_5 : f32 to vector<256x256xf32>
    %7 = arith.mulf %6, %5 : vector<256x256xf32>
    %8 = arith.maximumf %5, %7 : vector<256x256xf32>
    %c0_6 = arith.constant 0 : index
    %c0_7 = arith.constant 0 : index
    %9 = vector.load %arg4[%c0_6, %c0_7] : memref<256x128xf32, #tpu.memory_space<vmem>>, vector<256x128xf32>
    %cst_8 = arith.constant dense<0.000000e+00> : vector<256x128xf32>
    %10 = tpu.matmul %8, %9, %cst_8 {dimension_numbers = #tpu.dot_dimension_numbers<[1], [0], [0], [1], [0, 0, 1, 1], [], []>} : vector<256x256xf32>, vector<256x128xf32>, vector<256x128xf32> -> vector<256x128xf32>
    %c0_9 = arith.constant 0 : index
    %c0_10 = arith.constant 0 : index
    %11 = vector.load %arg5[%c0_9, %c0_10] : memref<1x128xf32, #tpu.memory_space<vmem>>, vector<1x128xf32>
    %12 = vector.broadcast %11 : vector<1x128xf32> to vector<256x128xf32>
    %13 = arith.addf %10, %12 : vector<256x128xf32>
    %cst_11 = arith.constant 0.00999999977 : f32
    %14 = vector.broadcast %cst_11 : f32 to vector<256x128xf32>
    %15 = arith.mulf %14, %13 : vector<256x128xf32>
    %16 = arith.maximumf %13, %15 : vector<256x128xf32>
    %c0_12 = arith.constant 0 : index
    %c0_13 = arith.constant 0 : index
    %17 = vector.load %arg6[%c0_12, %c0_13] : memref<128x64xf32, #tpu.memory_space<vmem>>, vector<128x64xf32>
    %cst_14 = arith.constant dense<0.000000e+00> : vector<256x64xf32>
    %18 = tpu.matmul %16, %17, %cst_14 {dimension_numbers = #tpu.dot_dimension_numbers<[1], [0], [0], [1], [0, 0, 1, 1], [], []>} : vector<256x128xf32>, vector<128x64xf32>, vector<256x64xf32> -> vector<256x64xf32>
    %c0_15 = arith.constant 0 : index
    %c0_16 = arith.constant 0 : index
    %19 = vector.load %arg7[%c0_15, %c0_16] : memref<1x64xf32, #tpu.memory_space<vmem>>, vector<1x64xf32>
    %20 = vector.broadcast %19 : vector<1x64xf32> to vector<256x64xf32>
    %21 = arith.addf %18, %20 : vector<256x64xf32>
    %cst_17 = arith.constant 0.00999999977 : f32
    %22 = vector.broadcast %cst_17 : f32 to vector<256x64xf32>
    %23 = arith.mulf %22, %21 : vector<256x64xf32>
    %24 = arith.maximumf %21, %23 : vector<256x64xf32>
    %c0_18 = arith.constant 0 : index
    %c0_19 = arith.constant 0 : index
    %25 = vector.load %arg8[%c0_18, %c0_19] : memref<64x32xf32, #tpu.memory_space<vmem>>, vector<64x32xf32>
    %cst_20 = arith.constant dense<0.000000e+00> : vector<256x32xf32>
    %26 = tpu.matmul %24, %25, %cst_20 {dimension_numbers = #tpu.dot_dimension_numbers<[1], [0], [0], [1], [0, 0, 1, 1], [], []>} : vector<256x64xf32>, vector<64x32xf32>, vector<256x32xf32> -> vector<256x32xf32>
    %c0_21 = arith.constant 0 : index
    %c0_22 = arith.constant 0 : index
    %27 = vector.load %arg9[%c0_21, %c0_22] : memref<1x32xf32, #tpu.memory_space<vmem>>, vector<1x32xf32>
    %28 = vector.broadcast %27 : vector<1x32xf32> to vector<256x32xf32>
    %29 = arith.addf %26, %28 : vector<256x32xf32>
    %cst_23 = arith.constant 0.00999999977 : f32
    %30 = vector.broadcast %cst_23 : f32 to vector<256x32xf32>
    %31 = arith.mulf %30, %29 : vector<256x32xf32>
    %32 = arith.maximumf %29, %31 : vector<256x32xf32>
    %c0_24 = arith.constant 0 : index
    %c0_25 = arith.constant 0 : index
    %33 = vector.load %arg10[%c0_24, %c0_25] : memref<1x32xf32, #tpu.memory_space<vmem>>, vector<1x32xf32>
    %cst_26 = arith.constant dense<0.000000e+00> : vector<1x256xf32>
    %34 = tpu.matmul %33, %32, %cst_26 {dimension_numbers = #tpu.dot_dimension_numbers<[1], [1], [0], [0], [0, 0, 1, 0], [], []>} : vector<1x32xf32>, vector<256x32xf32>, vector<1x256xf32> -> vector<1x256xf32>
    %c0_27 = arith.constant 0 : index
    %c0_28 = arith.constant 0 : index
    %35 = vector.load %arg11[%c0_27, %c0_28] : memref<1x1xf32, #tpu.memory_space<vmem>>, vector<1x1xf32>
    %36 = vector.broadcast %35 : vector<1x1xf32> to vector<1x256xf32>
    %37 = arith.addf %34, %36 : vector<1x256xf32>
    %cst_29 = arith.constant 0.000000e+00 : f32
    %38 = vector.broadcast %cst_29 : f32 to vector<1x256xf32>
    %39 = arith.subf %38, %37 : vector<1x256xf32>
    %40 = math.exp %39 : vector<1x256xf32>
    %cst_30 = arith.constant 1.000000e+00 : f32
    %41 = vector.broadcast %cst_30 : f32 to vector<1x256xf32>
    %42 = arith.addf %41, %40 : vector<1x256xf32>
    %cst_31 = arith.constant 1.000000e+00 : f32
    %43 = vector.broadcast %cst_31 : f32 to vector<1x256xf32>
    %44 = arith.divf %43, %42 : vector<1x256xf32>
    %c0_32 = arith.constant 0 : index
    %c0_33 = arith.constant 0 : index
    %45 = vector.load %arg12[%c0_32, %c0_33] : memref<1x256xf32, #tpu.memory_space<vmem>>, vector<1x256xf32>
    tpu.vector_store %arg12[%c0_32, %c0_33], %44 {strides = array<i32>} : memref<1x256xf32, #tpu.memory_space<vmem>>, vector<1x256xf32>,
    return
  }
  func.func @transform_0(%arg0: i32) -> (i32, i32) {
    %c0_i32 = arith.constant 0 : i32
    %c0_i32_0 = arith.constant 0 : i32
    return %arg0, %c0_i32 : i32, i32
  }
  func.func @transform_1(%arg0: i32) -> (i32, i32) {
    %c0_i32 = arith.constant 0 : i32
    %c0_i32_0 = arith.constant 0 : i32
    %c0_i32_1 = arith.constant 0 : i32
    return %c0_i32, %c0_i32_0 : i32, i32
  }
  func.func @transform_2(%arg0: i32) -> (i32, i32) {
    %c0_i32 = arith.constant 0 : i32
    %c0_i32_0 = arith.constant 0 : i32
    %c0_i32_1 = arith.constant 0 : i32
    return %c0_i32, %c0_i32_0 : i32, i32
  }
  func.func @transform_3(%arg0: i32) -> (i32, i32) {
    %c0_i32 = arith.constant 0 : i32
    %c0_i32_0 = arith.constant 0 : i32
    %c0_i32_1 = arith.constant 0 : i32
    return %c0_i32, %c0_i32_0 : i32, i32
  }
  func.func @transform_4(%arg0: i32) -> (i32, i32) {
    %c0_i32 = arith.constant 0 : i32
    %c0_i32_0 = arith.constant 0 : i32
    %c0_i32_1 = arith.constant 0 : i32
    return %c0_i32, %c0_i32_0 : i32, i32
  }
  func.func @transform_5(%arg0: i32) -> (i32, i32) {
    %c0_i32 = arith.constant 0 : i32
    %c0_i32_0 = arith.constant 0 : i32
    %c0_i32_1 = arith.constant 0 : i32
    return %c0_i32, %c0_i32_0 : i32, i32
  }
  func.func @transform_6(%arg0: i32) -> (i32, i32) {
    %c0_i32 = arith.constant 0 : i32
    %c0_i32_0 = arith.constant 0 : i32
    %c0_i32_1 = arith.constant 0 : i32
    return %c0_i32, %c0_i32_0 : i32, i32
  }
  func.func @transform_7(%arg0: i32) -> (i32, i32) {
    %c0_i32 = arith.constant 0 : i32
    %c0_i32_0 = arith.constant 0 : i32
    %c0_i32_1 = arith.constant 0 : i32
    return %c0_i32, %c0_i32_0 : i32, i32
  }
  func.func @transform_8(%arg0: i32) -> (i32, i32) {
    %c0_i32 = arith.constant 0 : i32
    %c0_i32_0 = arith.constant 0 : i32
    %c0_i32_1 = arith.constant 0 : i32
    return %c0_i32, %c0_i32_0 : i32, i32
  }
  func.func @transform_9(%arg0: i32) -> (i32, i32) {
    %c0_i32 = arith.constant 0 : i32
    %c0_i32_0 = arith.constant 0 : i32
    %c0_i32_1 = arith.constant 0 : i32
    return %c0_i32, %c0_i32_0 : i32, i32
  }
  func.func @transform_10(%arg0: i32) -> (i32, i32) {
    %c0_i32 = arith.constant 0 : i32
    %c0_i32_0 = arith.constant 0 : i32
    %c0_i32_1 = arith.constant 0 : i32
    return %c0_i32, %c0_i32_0 : i32, i32
  }
  func.func @transform_11(%arg0: i32) -> (i32, i32) {
    %c0_i32 = arith.constant 0 : i32
    %c0_i32_0 = arith.constant 0 : i32
    return %c0_i32, %arg0 : i32, i32
  }
}

</mosaic_0001>

<bundles_post_ra>
// kernel: tpu_custom_call.1
= control target key start
LH: loop header
LB: loop body
LE: loop exit
PB: predicated region body
PF: predicated region fallthrough
CT: control target
= control target key end

     0   :  { %s3671_s0 = inlined_call_operand.vmem [shape: f32[512,20], index: 0, kind: input, shape index: {}]   ;;  %s3672_s1 = inlined_call_operand.vmem [shape: f32[20,256], index: 1, kind: input, shape index: {}]   ;;  %s3673_s2 = inlined_call_operand.vmem [shape: f32[1,256], index: 2, kind: input, shape index: {}]   ;;  %s3674_s3 = inlined_call_operand.vmem [shape: f32[256,128], index: 3, kind: input, shape index: {}]   ;;  %s3675_s4 = inlined_call_operand.vmem [shape: f32[1,128], index: 4, kind: input, shape index: {}]   ;;  %s3676_s5 = inlined_call_operand.vmem [shape: f32[128,64], index: 5, kind: input, shape index: {}]   ;;  %s3677_s6 = inlined_call_operand.vmem [shape: f32[1,64], index: 6, kind: input, shape index: {}]   ;;  %s3678_s7 = inlined_call_operand.vmem [shape: f32[64,32], index: 7, kind: input, shape index: {}]   ;;  %s3679_s8 = inlined_call_operand.vmem [shape: f32[1,32], index: 8, kind: input, shape index: {}]   ;;  %s3680_s9 = inlined_call_operand.vmem [shape: f32[1,32], index: 9, kind: input, shape index: {}]   ;;  %s3681_s10 = inlined_call_operand.<no memory space> [shape: f32[1,1], index: 10, kind: input, shape index: {}]   ;;  %s3682_s11 = inlined_call_operand.hbm [shape: f32[1,512], index: 11, kind: output, shape index: {}]  }
   0x1   :  { %v16_v0 = vstv %s3681_s10 }
   0x2   :  { %17 = vst [vmem:[#allocation2] sm:$0x1] %v16_v0 }
   0x3   :  { %18 = vsyncpa [#allocation4], 0 }
   0x4   :  { %20 = vsyncpa [#allocation4 + $0x1], 0  ;;  %s2974_s19 = smov 0   ;;  %s2976_s20 = smov 0  }
   0x5   :  { %s2978_s21 = smov 0   ;;  %s2980_s22 = smov 0  }
   0x6 LB: > { %s2260_s10 = sadd.s32 4294967295, %s2904_s22   ;;  %s2261_s23 = sadd.s32 4294967294, %s2904_s22   ;;  %s2904_s22 = sphi %s2980_s22, %s3692_s22   ;;  %s2900_s21 = sphi %s2978_s21, %s3691_s21   ;;  %s2896_s20 = sphi %s2976_s20, %s3690_s20   ;;  %s2892_s19 = sphi %s2974_s19, %s3689_s19  }
   0x7   : > { %s2997_s24 = sadd.s32 1, %s2904_s22   ;;  %s269_s25 = sadd.s32 1, %s2900_s21 }
   0x8   : > { %s266_s26 = ssub.s32 %s2904_s22, %s2997_s24  ;;  %p279_p0 = scmp.ne.s32.totalorder %s2900_s21, %s2896_s20 }
   0x9   : > { %p267_p1 = scmp.eq.s32.totalorder %s266_s26, 0  ;;  %p280_p2 = scmp.eq.s32.totalorder %s2260_s10, 1 }
   0xa   : > { %p285_p3 = scmp.ne.s32.totalorder %s2896_s20, %s2892_s19  ;;  %p286_p4 = scmp.eq.s32.totalorder %s2261_s23, 1 }
   0xb   : > { %s3007_s27 = scalar_select %p267_p1, %s2900_s21, %s269_s25  }
   0xc   : > { %p3009_p5 = por %p280_p2, %p279_p0  ;;  %p3013_p6 = por %p286_p4, %p285_p3 }
   0xd   : > { %3683 = sst [smem:[#allocation6_spill]] %s3007_s27  ;;  %p2264_p7 = scmp.ge.s32.totalorder %s2904_s22, 1 }
   0xe   : > { %p343_p8 = scmp.lt.s32.totalorder %s2904_s22, 3 }
  0x10   : > { %p344_p9 = pnand %p2264_p7, %p343_p8 }
  0x11   : > { %v423_v1 = vld [vmem:[%s3672_s1 + $0x8] sm:$0xff] (!%p344_p9)  ;;  %v425_v2 = vld [vmem:[%s3672_s1 + $0x18] sm:$0xff] (!%p344_p9)  ;;  %v422_v3 = vld [vmem:[%s3672_s1] sm:$0xff] (!%p344_p9)  ;;  %s3028_s17 = sshll.u32 (!%p344_p9), %s2260_s10, 5  ;;  %v2906_v6 = vmov (!%p344_p9), 0.0   ;;  %vm537_vm0 = vcmask (!%p344_p9), 1043456  }
  0x12   : > { %347 = sbr.rel (%p344_p9) target bundleno = 1304 (0x518), region = 64  ;;  %v2642_v4 = vpack.c.bf16 (!%p344_p9), %v425_v2, %v423_v1  ;;  %v424_v5 = vld [vmem:[%s3672_s1 + $0x10] sm:$0xff] (!%p344_p9)  ;;  %608 = vmatprep.mubr.f32.mxu0 (!%p344_p9), %v2906_v6  ;;  %p384_p10 = scmp.lt.s32.totalorder (!%p344_p9), %s3028_s17, 63  ;;  %v427_v8 = vld [vmem:[%s3672_s1 + $0x28] sm:$0xf] (!%p344_p9)  ;;  %v929_v10 = vld [vmem:[%s3674_s3] sm:$0xff] (!%p344_p9) }
  0x13   : > { %v2644_v7 = vpack.c.bf16 (!%p344_p9), %v424_v5, %v422_v3  ;;  %v426_v9 = vld [vmem:[%s3672_s1 + $0x20] sm:$0xf] (!%p344_p9)  ;;  %v930_v11 = vld [vmem:[%s3674_s3 + $0x8] sm:$0xff] (!%p344_p9)  ;;  %v931_v12 = vld [vmem:[%s3674_s3 + $0x10] sm:$0xff] (!%p344_p9)  ;;  %vm440_vm1 = vcmask (!%p344_p9), 162816   ;;  %v2907_v13 = vmov (!%p344_p9), 0.0|0.0   ;;  %s3629_s16 = scalar_lea.hbm (!%p344_p9), %s3682_s11, %s3028_s17 }
  0x14   : > { %2643 = vmatprep.subr.bf16.mxu0 (!%p344_p9), %v2642_v4  ;;  %2646 = vmatprep.subr.bf16.mxu1 (!%p344_p9), %v2907_v13  ;;  %v2647_v14 = vpack.c.bf16 (!%p344_p9), %v930_v11, %v929_v10  ;;  %v932_v15 = vld [vmem:[%s3674_s3 + $0x18] sm:$0xff] (!%p344_p9)  ;;  %v933_v18 = vld [vmem:[%s3674_s3 + $0x20] sm:$0xff] (!%p344_p9)  ;;  %v934_v19 = vld [vmem:[%s3674_s3 + $0x28] sm:$0xff] (!%p344_p9)  ;;  %vm1584_vm2 = vcmask (!%p344_p9), 523264   ;;  %vm1981_vm3 = vcmask (!%p344_p9), 261120   ;;  %s380_s12 = sand.u32 (!%p344_p9), 1, %s2896_s20  }
  0x15   : > { %2645 = vmatpush1.bf16.msra.mxu0 (!%p344_p9), %v2644_v7  ;;  %v2650_v17 = vpack.c.bf16 (!%p344_p9), %v932_v15, %v931_v12  ;;  %v2653_v21 = vpack.c.bf16 (!%p344_p9), %v934_v19, %v933_v18  ;;  %v935_v24 = vld [vmem:[%s3674_s3 + $0x30] sm:$0xff] (!%p344_p9)  ;;  %v936_v25 = vld [vmem:[%s3674_s3 + $0x38] sm:$0xff] (!%p344_p9)  ;;  %v937_v26 = vld [vmem:[%s3674_s3 + $0x40] sm:$0xff] (!%p344_p9)  ;;  %s2265_s27 = sshll.u32 (!%p344_p9), %s380_s12, 1  ;;  %s2188_s18 = scalar_lea.sflag (!%p344_p9), [#allocation4], %s380_s12 }
  0x16   : > { %2268 = vmatprep.subr.msk.mxu0 (!%p344_p9), %vm537_vm0, %v427_v8  ;;  %2648 = vmatpush1.bf16.msra.mxu1 (!%p344_p9), %v2647_v14  ;;  %v938_v27 = vld [vmem:[%s3674_s3 + $0x48] sm:$0xff] (!%p344_p9)  ;;  %v2656_v28 = vpack.c.bf16 (!%p344_p9), %v936_v25, %v935_v24  ;;  %v939_v31 = vld [vmem:[%s3674_s3 + $0x50] sm:$0xff] (!%p344_p9)  ;;  %v940_v32 = vld [vmem:[%s3674_s3 + $0x58] sm:$0xff] (!%p344_p9)  ;;  %s2910_s25 = smov (!%p344_p9), [#allocation3]  }
  0x17   : > { %2649 = vmatprep.subr.bf16.mxu1 (!%p344_p9), %v2907_v13  ;;  %v2659_v29 = vpack.c.bf16 (!%p344_p9), %v938_v27, %v937_v26  ;;  %v2662_v33 = vpack.c.bf16 (!%p344_p9), %v940_v32, %v939_v31  ;;  %v941_v35 = vld [vmem:[%s3674_s3 + $0x60] sm:$0xff] (!%p344_p9)  ;;  %v942_v36 = vld [vmem:[%s3674_s3 + $0x68] sm:$0xff] (!%p344_p9)  ;;  %v943_v39 = vld [vmem:[%s3674_s3 + $0x70] sm:$0xff] (!%p344_p9)  ;;  %s2846_s26 = sshll.u32 (!%p344_p9), %s2910_s25, 4  ;;  %s2847_s26 = int_to_ptr.vmem [resolvable:$false] %s2846_s26 }
  0x18   : > { %v2665_v37 = vpack.c.bf16 (!%p344_p9), %v942_v36, %v941_v35  ;;  %v944_v40 = vld [vmem:[%s3674_s3 + $0x78] sm:$0xff] (!%p344_p9)  ;;  %v945_v43 = vld [vmem:[%s3674_s3 + $0x80] sm:$0xff] (!%p344_p9)  ;;  %v946_v44 = vld [vmem:[%s3674_s3 + $0x88] sm:$0xff] (!%p344_p9) }
  0x19   : > { %s385_s10 = scalar_select %p384_p10, %s3028_s17, 63  ;;  %2269 = vmatpush1.msk.msra.mxu0 %vm537_vm0, %v426_v9  ;;  %v2668_v41 = vpack.c.bf16 %v944_v40, %v943_v39  ;;  %v2671_v45 = vpack.c.bf16 %v946_v44, %v945_v43  ;;  %v947_v47 = vld [vmem:[%s3674_s3 + $0x90] sm:$0xff]  ;;  %v948_v48 = vld [vmem:[%s3674_s3 + $0x98] sm:$0xff]  ;;  %v949_v51 = vld [vmem:[%s3674_s3 + $0xa0] sm:$0xff] }
  0x1a   : > { %2651 = vmatpush1.bf16.msra.mxu1 %v2650_v17  ;;  %v2674_v49 = vpack.c.bf16 %v948_v48, %v947_v47  ;;  %v950_v52 = vld [vmem:[%s3674_s3 + $0xa8] sm:$0xff]  ;;  %v951_v55 = vld [vmem:[%s3674_s3 + $0xb0] sm:$0xff]  ;;  %v952_v56 = vld [vmem:[%s3674_s3 + $0xb8] sm:$0xff] }
  0x1b   : > { %s2267_s13 = sshll.u32 %s385_s10, 3  ;;  %2652 = vmatprep.subr.bf16.mxu1 %v2907_v13  ;;  %v2677_v53 = vpack.c.bf16 %v950_v52, %v949_v51  ;;  %v2680_v57 = vpack.c.bf16 %v952_v56, %v951_v55  ;;  %v953_v59 = vld [vmem:[%s3674_s3 + $0xc0] sm:$0xff]  ;;  %v954_v60 = vld [vmem:[%s3674_s3 + $0xc8] sm:$0xff]  ;;  %v955_v63 = vld [vmem:[%s3674_s3 + $0xd0] sm:$0xff]  ;;  %s2848_s10 = scalar_lea.vmem %s2847_s26, 64 }
  0x1c   : > { %s3055_s30 = scalar_lea.vmem %s3671_s0, %s2267_s13  ;;  %v2683_v61 = vpack.c.bf16 %v954_v60, %v953_v59  ;;  %v956_v0 = vld [vmem:[%s3674_s3 + $0xd8] sm:$0xff]  ;;  %v957_v12 = vld [vmem:[%s3674_s3 + $0xe0] sm:$0xff]  ;;  %v958_v14 = vld [vmem:[%s3674_s3 + $0xe8] sm:$0xff]  ;;  %s382_s13 = scalar_lea.vmem [#allocation3], %s2265_s27 }
  0x1d   : > { %v390_v16 = vld [vmem:[%s3055_s30] sm:$0xff]  ;;  %v391_v20 = vld [vmem:[%s3055_s30 + $0x8] sm:$0xff]  ;;  %v392_v22 = vld [vmem:[%s3055_s30 + $0x10] sm:$0xff]  ;;  %v2686_v1 = vpack.c.bf16 %v956_v0, %v955_v63  ;;  %v2689_v15 = vpack.c.bf16 %v958_v14, %v957_v12  ;;  %s2202_s14 = sshll.u32 %s382_s13, 4  ;;  %s3631_s14 = int_to_ptr.vmem [resolvable:$true] %s2202_s14 }
  0x1e   : > { %2270 = vmatmul.mubr.msk.f32.vlgmr.msra.gmra.mrb[0].mxu0 %vm440_vm1, %v390_v16  ;;  %2654 = vmatpush1.bf16.msra.mxu1 %v2653_v21  ;;  %v393_v23 = vld [vmem:[%s3055_s30 + $0x18] sm:$0xff]  ;;  %v394_v30 = vld [vmem:[%s3055_s30 + $0x20] sm:$0xff]  ;;  %v395_v34 = vld [vmem:[%s3055_s30 + $0x28] sm:$0xff]  ;;  %s2842_s23 = scalar_lea.vmem %s3631_s14, 32  ;;  %p2849_p0 = scmp.lt.s32.totalorder %s3631_s14, %s2847_s26 }
  0x1f   : > { %614 = vmatprep.mubr.f32.mxu0 %v2906_v6  ;;  %2655 = vmatprep.subr.bf16.mxu1 %v2907_v13  ;;  %v396_v38 = vld [vmem:[%s3055_s30 + $0x30] sm:$0xff]  ;;  %v397_v42 = vld [vmem:[%s3055_s30 + $0x38] sm:$0xff]  ;;  %v398_v46 = vld [vmem:[%s3055_s30 + $0x40] sm:$0xff]  ;;  %p2843_p11 = scmp.ne.s32.totalorder %s3631_s14, %s2842_s23  ;;  %p2850_p1 = scmp.lt.s32.totalorder %s2848_s10, %s2842_s23 }
  0x20   : > { %v399_v50 = vld [vmem:[%s3055_s30 + $0x48] sm:$0xff]  ;;  %v400_v54 = vld [vmem:[%s3055_s30 + $0x50] sm:$0xff]  ;;  %v401_v58 = vld [vmem:[%s3055_s30 + $0x58] sm:$0xff] }
  0x21   : > { %v402_v62 = vld [vmem:[%s3055_s30 + $0x60] sm:$0xff]  ;;  %v403_v2 = vld [vmem:[%s3055_s30 + $0x68] sm:$0xff]  ;;  %v404_v3 = vld [vmem:[%s3055_s30 + $0x70] sm:$0xff]  ;;  %p2844_p12 = pnand %p2843_p11, %p3009_p5  ;;  %p2851_p2 = por %p2850_p1, %p2849_p0 }
  0x22   : > { %2271 = vmatmul.mubr.msk.f32.gmra.mrb[2].mxu0 %vm440_vm1, %v391_v20  ;;  %2657 = vmatpush1.bf16.msra.mxu1 %v2656_v28  ;;  %v405_v4 = vld [vmem:[%s3055_s30 + $0x78] sm:$0xff]  ;;  %v406_v5 = vld [vmem:[%s3055_s30 + $0x80] sm:$0xff]  ;;  %v407_v7 = vld [vmem:[%s3055_s30 + $0x88] sm:$0xff]  ;;  %v430_v28 = vlaneseq }
  0x23   : > { %620 = vmatprep.mubr.f32.mxu0 %v2906_v6  ;;  %2658 = vmatprep.subr.bf16.mxu1 %v2907_v13  ;;  %v408_v8 = vld [vmem:[%s3055_s30 + $0x90] sm:$0xff]  ;;  %v409_v9 = vld [vmem:[%s3055_s30 + $0x98] sm:$0xff]  ;;  %v410_v10 = vld [vmem:[%s3055_s30 + $0xa0] sm:$0xff]  ;;  %p2845_p13 = pneg %p2844_p12 }
  0x24   : > { %v411_v11 = vld [vmem:[%s3055_s30 + $0xa8] sm:$0xff]  ;;  %v412_v16 = vld [vmem:[%s3055_s30 + $0xb0] sm:$0xff]  ;;  %v960_v18 = vld [vmem:[%s3674_s3 + $0xf8] sm:$0xff]  ;;  %vm2184_vm5 = vcmp.lt.s32.totalorder %v430_v28, 256 }
  0x25   : > { %v959_v17 = vld [vmem:[%s3674_s3 + $0xf0] sm:$0xff]  ;;  %v413_v20 = vld [vmem:[%s3055_s30 + $0xb8] sm:$0xff]  ;;  %v415_v21 = vld [vmem:[%s3055_s30 + $0xc8] sm:$0xff]  ;;  %p2852_p3 = pnand %p2851_p2, %p2845_p13 }
  0x26   : > { %2272 = vmatmul.mubr.msk.f32.gmra.mrb[4].mxu0 %vm440_vm1, %v392_v22  ;;  %2660 = vmatpush1.bf16.msra.mxu1 %v2659_v29  ;;  %v2692_v19 = vpack.c.bf16 %v960_v18, %v959_v17  ;;  %v416_v22 = vld [vmem:[%s3055_s30 + $0xd0] sm:$0xff]  ;;  %v418_v24 = vld [vmem:[%s3055_s30 + $0xe0] sm:$0xff]  ;;  %v419_v25 = vld [vmem:[%s3055_s30 + $0xe8] sm:$0xff]  ;;  %v3257_v29 = vshrl.u32 %v430_v28, 7 }
  0x27   : > { %626 = vmatprep.mubr.f32.mxu0 %v2906_v6  ;;  %2661 = vmatprep.subr.bf16.mxu1 %v2907_v13  ;;  %v420_v26 = vld [vmem:[%s3055_s30 + $0xf0] sm:$0xff]  ;;  %v421_v27 = vld [vmem:[%s3055_s30 + $0xf8] sm:$0xff]  ;;  %v428_v31 = vld [vmem:[%s3673_s2] sm:$0x3] }
  0x28   : > { %v436_v32 = vsub.s32 1, %v3257_v29  ;;  %v1257_v43 = vld [vmem:[%s3676_s5] sm:$0xff]  ;;  %v1258_v44 = vld [vmem:[%s3676_s5 + $0x8] sm:$0xff]  ;;  %v1263_v0 = vld [vmem:[%s3676_s5 + $0x30] sm:$0xff] }
  0x29   : > { %v2694_v48 = vpack.c.bf16 %v1258_v44, %v1257_v43  ;;  %v1265_v12 = vld [vmem:[%s3676_s5 + $0x40] sm:$0xff]  ;;  %v1266_v14 = vld [vmem:[%s3676_s5 + $0x48] sm:$0xff]  ;;  %vm3560_vm4 = vmpackc.low %vm1981_vm3, %vm1981_vm3 }
  0x2a   : > { %2273 = vmatmul.mubr.msk.f32.gmra.mrb[6].mxu0 %vm440_vm1, %v393_v23  ;;  %2663 = vmatpush1.bf16.msra.mxu1 %v2662_v33  ;;  %v417_v23 = vld [vmem:[%s3055_s30 + $0xd8] sm:$0xff] }
  0x2b   : > { %632 = vmatprep.mubr.f32.mxu0 %v2906_v6  ;;  %2664 = vmatprep.subr.bf16.mxu1 %v2907_v13 }
  0x2c   : > { %2695 = vmatprep.subr.bf16.mxu0 %v2694_v48 }
  0x2d   : > { %2697 = vmatpush3.bf16.msra.mxu0 %v2694_v48 }
  0x2e   : > { %2274 = vmatmul.mubr.msk.f32.gmra.mrb[8].mxu0 %vm440_vm1, %v394_v30  ;;  %2666 = vmatpush1.bf16.msra.mxu1 %v2665_v37  ;;  %v432_v30 = vsub.s32 0, %v3257_v29 }
  0x2f   : > { %638 = vmatprep.mubr.f32.mxu0 %v2906_v6  ;;  %2667 = vmatprep.subr.bf16.mxu1 %v2907_v13 }
  0x30   : > { %v3266_v33 = vrot.slane %v428_v31, %v432_v30 }
  0x32   : > { %2275 = vmatmul.mubr.msk.f32.gmra.mrb[10].mxu0 %vm440_vm1, %v395_v34  ;;  %2669 = vmatpush1.bf16.msra.mxu1 %v2668_v41 }
  0x33   : > { %644 = vmatprep.mubr.f32.mxu0 %v2906_v6  ;;  %2670 = vmatprep.subr.bf16.mxu1 %v2907_v13 }
  0x36   : > { %2276 = vmatmul.mubr.msk.f32.gmra.mrb[12].mxu0 %vm440_vm1, %v396_v38  ;;  %2672 = vmatpush1.bf16.msra.mxu1 %v2671_v45  ;;  %v1259_v45 = vld [vmem:[%s3676_s5 + $0x10] sm:$0xff] }
  0x37   : > { %650 = vmatprep.mubr.f32.mxu0 %v2906_v6  ;;  %2673 = vmatprep.subr.bf16.mxu1 %v2907_v13 }
  0x3a   : > { %2277 = vmatmul.mubr.msk.f32.gmra.mrb[14].mxu0 %vm440_vm1, %v397_v42  ;;  %2675 = vmatpush1.bf16.msra.mxu1 %v2674_v49  ;;  %v1260_v49 = vld [vmem:[%s3676_s5 + $0x18] sm:$0xff] }
  0x3b   : > { %656 = vmatprep.mubr.f32.mxu0 %v2906_v6  ;;  %2676 = vmatprep.subr.bf16.mxu1 %v2907_v13  ;;  %v2698_v52 = vpack.c.bf16 %v1260_v49, %v1259_v45 }
  0x3d   : > { %2699 = vmatprep.subr.bf16.mxu0 %v2698_v52 }
  0x3e   : > { %2278 = vmatmul.mubr.msk.f32.gmra.mrb[16].mxu0 %vm440_vm1, %v398_v46  ;;  %2678 = vmatpush1.bf16.msra.mxu1 %v2677_v53  ;;  %v1261_v53 = vld [vmem:[%s3676_s5 + $0x20] sm:$0xff] }
  0x3f   : > { %662 = vmatprep.mubr.f32.mxu0 %v2906_v6  ;;  %2679 = vmatprep.subr.bf16.mxu1 %v2907_v13 }
  0x40   : > { %2701 = vmatpush3.bf16.msra.mxu0 %v2698_v52 }
  0x42   : > { %2279 = vmatmul.mubr.msk.f32.gmra.mrb[18].mxu0 %vm440_vm1, %v399_v50  ;;  %2681 = vmatpush1.bf16.msra.mxu1 %v2680_v57 }
  0x43   : > { %668 = vmatprep.mubr.f32.mxu0 %v2906_v6  ;;  %2682 = vmatprep.subr.bf16.mxu1 %v2907_v13 }
  0x46   : > { %2280 = vmatmul.mubr.msk.f32.gmra.mrb[20].mxu0 %vm440_vm1, %v400_v54  ;;  %2684 = vmatpush1.bf16.msra.mxu1 %v2683_v61  ;;  %v1262_v54 = vld [vmem:[%s3676_s5 + $0x28] sm:$0xff] }
  0x47   : > { %674 = vmatprep.mubr.f32.mxu0 %v2906_v6  ;;  %2685 = vmatprep.subr.bf16.mxu1 %v2907_v13  ;;  %v2702_v61 = vpack.c.bf16 %v1262_v54, %v1261_v53 }
  0x49   : > { %2703 = vmatprep.subr.bf16.mxu0 %v2702_v61 }
  0x4a   : > { %2281 = vmatmul.mubr.msk.f32.gmra.mrb[22].mxu0 %vm440_vm1, %v401_v58  ;;  %2687 = vmatpush1.bf16.msra.mxu1 %v2686_v1  ;;  %v1264_v1 = vld [vmem:[%s3676_s5 + $0x38] sm:$0xff] }
  0x4b   : > { %680 = vmatprep.mubr.f32.mxu0 %v2906_v6  ;;  %2688 = vmatprep.subr.bf16.mxu1 %v2907_v13 }
  0x4c   : > { %2705 = vmatpush3.bf16.msra.mxu0 %v2702_v61 }
  0x4e   : > { %2282 = vmatmul.mubr.msk.f32.gmra.mrb[24].mxu0 %vm440_vm1, %v402_v62  ;;  %2690 = vmatpush1.bf16.msra.mxu1 %v2689_v15 }
  0x4f   : > { %686 = vmatprep.mubr.f32.mxu0 %v2906_v6  ;;  %2691 = vmatprep.subr.bf16.mxu1 %v2907_v13  ;;  %v414_v13 = vld [vmem:[%s3055_s30 + $0xc0] sm:$0xff] }
  0x52   : > { %2283 = vmatmul.mubr.msk.f32.gmra.mrb[26].mxu0 %vm440_vm1, %v403_v2  ;;  %2693 = vmatpush1.bf16.msra.mxu1 %v2692_v19 }
  0x53   : > { %692 = vmatprep.mubr.f32.mxu0 %v2906_v6 }
  0x56   : > { %2284 = vmatmul.mubr.msk.f32.gmra.mrb[28].mxu0 %vm440_vm1, %v404_v3 }
  0x57   : > { %698 = vmatprep.mubr.f32.mxu0 %v2906_v6 }
  0x5a   : > { %2285 = vmatmul.mubr.msk.f32.gmra.mrb[30].mxu0 %vm440_vm1, %v405_v4 }
  0x5b   : > { %704 = vmatprep.mubr.f32.mxu0 %v2906_v6 }
  0x5e   : > { %2286 = vmatmul.mubr.msk.f32.gmra.mrb[32].mxu0 %vm440_vm1, %v406_v5 }
  0x5f   : > { %710 = vmatprep.mubr.f32.mxu0 %v2906_v6 }
  0x62   : > { %2287 = vmatmul.mubr.msk.f32.gmra.mrb[34].mxu0 %vm440_vm1, %v407_v7 }
  0x63   : > { %716 = vmatprep.mubr.f32.mxu0 %v2906_v6 }
  0x66   : > { %2288 = vmatmul.mubr.msk.f32.gmra.mrb[36].mxu0 %vm440_vm1, %v408_v8 }
  0x67   : > { %722 = vmatprep.mubr.f32.mxu0 %v2906_v6 }
  0x6a   : > { %2289 = vmatmul.mubr.msk.f32.gmra.mrb[38].mxu0 %vm440_vm1, %v409_v9  ;;  %v2706_v9 = vpack.c.bf16 %v1264_v1, %v1263_v0 }
  0x6b   : > { %728 = vmatprep.mubr.f32.mxu0 %v2906_v6 }
  0x6c   : > { %2707 = vmatprep.subr.bf16.mxu0 %v2706_v9 }
  0x6d   : > { %2709 = vmatpush3.bf16.msra.mxu0 %v2706_v9 }
  0x6e   : > { %2290 = vmatmul.mubr.msk.f32.gmra.mrb[40].mxu0 %vm440_vm1, %v410_v10 }
  0x6f   : > { %734 = vmatprep.mubr.f32.mxu0 %v2906_v6 }
  0x72   : > { %2291 = vmatmul.mubr.msk.f32.gmra.mrb[42].mxu0 %vm440_vm1, %v411_v11 }
  0x73   : > { %740 = vmatprep.mubr.f32.mxu0 %v2906_v6 }
  0x76   : > { %2292 = vmatmul.mubr.msk.f32.gmra.mrb[44].mxu0 %vm440_vm1, %v412_v16 }
  0x77   : > { %746 = vmatprep.mubr.f32.mxu0 %v2906_v6 }
  0x7a   : > { %2293 = vmatmul.mubr.msk.f32.gmra.mrb[46].mxu0 %vm440_vm1, %v413_v20 }
  0x7b   : > { %752 = vmatprep.mubr.f32.mxu0 %v2906_v6 }
  0x7e   : > { %2294 = vmatmul.mubr.msk.f32.gmra.mrb[48].mxu0 %vm440_vm1, %v414_v13  ;;  %v2710_v13 = vpack.c.bf16 %v1266_v14, %v1265_v12 }
  0x7f   : > { %758 = vmatprep.mubr.f32.mxu0 %v2906_v6 }
  0x80   : > { %2711 = vmatprep.subr.bf16.mxu0 %v2710_v13 }
  0x81   : > { %2713 = vmatpush3.bf16.msra.mxu0 %v2710_v13 }
  0x82   : > { %2295 = vmatmul.mubr.msk.f32.gmra.mrb[50].mxu0 %vm440_vm1, %v415_v21 }
  0x83   : > { %764 = vmatprep.mubr.f32.mxu0 %v2906_v6 }
  0x86   : > { %2296 = vmatmul.mubr.msk.f32.gmra.mrb[52].mxu0 %vm440_vm1, %v416_v22 }
  0x87   : > { %770 = vmatprep.mubr.f32.mxu0 %v2906_v6 }
  0x8a   : > { %2297 = vmatmul.mubr.msk.f32.gmra.mrb[54].mxu0 %vm440_vm1, %v417_v23  ;;  %v1267_v23 = vld [vmem:[%s3676_s5 + $0x50] sm:$0xff] }
  0x8b   : > { %776 = vmatprep.mubr.f32.mxu0 %v2906_v6 }
  0x8e   : > { %2298 = vmatmul.mubr.msk.f32.gmra.mrb[56].mxu0 %vm440_vm1, %v418_v24  ;;  %v1268_v24 = vld [vmem:[%s3676_s5 + $0x58] sm:$0xff] }
  0x8f   : > { %782 = vmatprep.mubr.f32.mxu0 %v2906_v6 }
  0x92   : > { %2299 = vmatmul.mubr.msk.f32.gmra.mrb[58].mxu0 %vm440_vm1, %v419_v25 }
  0x93   : > { %788 = vmatprep.mubr.f32.mxu0 %v2906_v6 }
  0x96   : > { %2300 = vmatmul.mubr.msk.f32.gmra.mrb[60].mxu0 %vm440_vm1, %v420_v26 }
  0x97   : > { %794 = vmatprep.mubr.f32.mxu0 %v2906_v6  ;;  %v3268_v6 = vrot.slane %v428_v31, %v436_v32 }
  0x9a   : > { %2301 = vmatmul.mubr.msk.f32.gmra.mrb[62].mxu0 %vm440_vm1, %v421_v27 }
  0xf1   : > { %v610_v34 = vpop.f32.mrb[0].mxu0 }
  0xf2   : > { %v611_v35 = vadd.f32 %v610_v34, %v3266_v33  ;;  %v612_v36 = vpop.f32.mrb[1].mxu0 }
  0xf3   : > { %v613_v37 = vadd.f32 %v612_v36, %v3268_v6 }
  0xf4   : > { %v801_v38 = vmul.f32 0.01, %v611_v35 }
  0xf5   : > { %v616_v39 = vpop.f32.mrb[2].mxu0  ;;  %v802_v40 = vmul.f32 0.01, %v613_v37 }
  0xf6   : > { %v617_v41 = vadd.f32 %v616_v39, %v3266_v33  ;;  %v618_v42 = vpop.f32.mrb[3].mxu0  ;;  %v865_v50 = vmax.f32 %v611_v35, %v801_v38  ;;  %v2714_v35 = vpack.c.bf16 %v1268_v24, %v1267_v23 }
  0xf7   : > { %v619_v46 = vadd.f32 %v618_v42, %v3268_v6  ;;  %v866_v47 = vmax.f32 %v613_v37, %v802_v40 }
  0xf8   : > { %v803_v51 = vmul.f32 0.01, %v617_v41  ;;  %2715 = vmatprep.subr.bf16.mxu0 %v2714_v35 }
  0xf9   : > { %v804_v55 = vmul.f32 0.01, %v619_v46  ;;  %v622_v56 = vpop.f32.mrb[4].mxu0  ;;  %1032 = vmatprep.mubr.f32.mxu1 %v866_v47  ;;  %2717 = vmatpush3.bf16.msra.mxu0 %v2714_v35 }
  0xfa   : > { %v623_v57 = vadd.f32 %v622_v56, %v3266_v33  ;;  %v624_v58 = vpop.f32.mrb[5].mxu0  ;;  %1033 = vmatmul.mubr.f32.vlgmr.msra.gmra.mrb[0].mxu1 %v865_v50  ;;  %v867_v62 = vmax.f32 %v617_v41, %v803_v51 }
  0xfb   : > { %v868_v59 = vmax.f32 %v619_v46, %v804_v55  ;;  %v625_v60 = vadd.f32 %v624_v58, %v3268_v6 }
  0xfc   : > { %v805_v63 = vmul.f32 0.01, %v623_v57 }
  0xfd   : > { %v806_v2 = vmul.f32 0.01, %v625_v60  ;;  %v628_v3 = vpop.f32.mrb[6].mxu0  ;;  %1037 = vmatprep.mubr.f32.mxu1 %v868_v59 }
  0xfe   : > { %v629_v4 = vadd.f32 %v628_v3, %v3266_v33  ;;  %v630_v5 = vpop.f32.mrb[7].mxu0  ;;  %1038 = vmatmul.mubr.f32.gmra.mrb[2].mxu1 %v867_v62  ;;  %v869_v10 = vmax.f32 %v623_v57, %v805_v63 }
  0xff   : > { %v870_v7 = vmax.f32 %v625_v60, %v806_v2  ;;  %v631_v8 = vadd.f32 %v630_v5, %v3268_v6 }
 0x100   : > { %v807_v11 = vmul.f32 0.01, %v629_v4 }
 0x101   : > { %v808_v15 = vmul.f32 0.01, %v631_v8  ;;  %v634_v16 = vpop.f32.mrb[8].mxu0  ;;  %1042 = vmatprep.mubr.f32.mxu1 %v870_v7 }
 0x102   : > { %v635_v17 = vadd.f32 %v634_v16, %v3266_v33  ;;  %v636_v18 = vpop.f32.mrb[9].mxu0  ;;  %1043 = vmatmul.mubr.f32.gmra.mrb[4].mxu1 %v869_v10  ;;  %v871_v21 = vmax.f32 %v629_v4, %v807_v11 }
 0x103   : > { %v872_v19 = vmax.f32 %v631_v8, %v808_v15  ;;  %v637_v20 = vadd.f32 %v636_v18, %v3268_v6 }
 0x104   : > { %v809_v22 = vmul.f32 0.01, %v635_v17 }
 0x105   : > { %v810_v25 = vmul.f32 0.01, %v637_v20  ;;  %v640_v26 = vpop.f32.mrb[10].mxu0  ;;  %1047 = vmatprep.mubr.f32.mxu1 %v872_v19 }
 0x106   : > { %v641_v27 = vadd.f32 %v640_v26, %v3266_v33  ;;  %v642_v31 = vpop.f32.mrb[11].mxu0  ;;  %1048 = vmatmul.mubr.f32.gmra.mrb[6].mxu1 %v871_v21  ;;  %v873_v36 = vmax.f32 %v635_v17, %v809_v22 }
 0x107   : > { %v874_v32 = vmax.f32 %v637_v20, %v810_v25  ;;  %v643_v34 = vadd.f32 %v642_v31, %v3268_v6 }
 0x108   : > { %v811_v37 = vmul.f32 0.01, %v641_v27 }
 0x109   : > { %v812_v38 = vmul.f32 0.01, %v643_v34  ;;  %v646_v39 = vpop.f32.mrb[12].mxu0  ;;  %1052 = vmatprep.mubr.f32.mxu1 %v874_v32 }
 0x10a   : > { %v647_v40 = vadd.f32 %v646_v39, %v3266_v33  ;;  %v648_v41 = vpop.f32.mrb[13].mxu0  ;;  %1053 = vmatmul.mubr.f32.gmra.mrb[8].mxu1 %v873_v36  ;;  %v875_v44 = vmax.f32 %v641_v27, %v811_v37 }
 0x10b   : > { %v876_v42 = vmax.f32 %v643_v34, %v812_v38  ;;  %v649_v43 = vadd.f32 %v648_v41, %v3268_v6 }
 0x10c   : > { %v813_v45 = vmul.f32 0.01, %v647_v40 }
 0x10d   : > { %v814_v46 = vmul.f32 0.01, %v649_v43  ;;  %v652_v47 = vpop.f32.mrb[14].mxu0  ;;  %1057 = vmatprep.mubr.f32.mxu1 %v876_v42 }
 0x10e   : > { %v653_v48 = vadd.f32 %v652_v47, %v3266_v33  ;;  %v654_v49 = vpop.f32.mrb[15].mxu0  ;;  %1058 = vmatmul.mubr.f32.gmra.mrb[10].mxu1 %v875_v44  ;;  %v877_v52 = vmax.f32 %v647_v40, %v813_v45 }
 0x10f   : > { %v878_v50 = vmax.f32 %v649_v43, %v814_v46  ;;  %v655_v51 = vadd.f32 %v654_v49, %v3268_v6 }
 0x110   : > { %v815_v53 = vmul.f32 0.01, %v653_v48 }
 0x111   : > { %v816_v54 = vmul.f32 0.01, %v655_v51  ;;  %v658_v55 = vpop.f32.mrb[16].mxu0  ;;  %1062 = vmatprep.mubr.f32.mxu1 %v878_v50 }
 0x112   : > { %v659_v56 = vadd.f32 %v658_v55, %v3266_v33  ;;  %v660_v57 = vpop.f32.mrb[17].mxu0  ;;  %1063 = vmatmul.mubr.f32.gmra.mrb[12].mxu1 %v877_v52  ;;  %v879_v60 = vmax.f32 %v653_v48, %v815_v53 }
 0x113   : > { %v880_v58 = vmax.f32 %v655_v51, %v816_v54  ;;  %v661_v59 = vadd.f32 %v660_v57, %v3268_v6 }
 0x114   : > { %v817_v61 = vmul.f32 0.01, %v659_v56 }
 0x115   : > { %v818_v62 = vmul.f32 0.01, %v661_v59  ;;  %v664_v63 = vpop.f32.mrb[18].mxu0  ;;  %1067 = vmatprep.mubr.f32.mxu1 %v880_v58 }
 0x116   : > { %v665_v0 = vadd.f32 %v664_v63, %v3266_v33  ;;  %v666_v1 = vpop.f32.mrb[19].mxu0  ;;  %1068 = vmatmul.mubr.f32.gmra.mrb[14].mxu1 %v879_v60  ;;  %v881_v4 = vmax.f32 %v659_v56, %v817_v61 }
 0x117   : > { %v882_v2 = vmax.f32 %v661_v59, %v818_v62  ;;  %v667_v3 = vadd.f32 %v666_v1, %v3268_v6 }
 0x118   : > { %v819_v5 = vmul.f32 0.01, %v665_v0 }
 0x119   : > { %v820_v7 = vmul.f32 0.01, %v667_v3  ;;  %v670_v8 = vpop.f32.mrb[20].mxu0  ;;  %1072 = vmatprep.mubr.f32.mxu1 %v882_v2 }
 0x11a   : > { %v671_v9 = vadd.f32 %v670_v8, %v3266_v33  ;;  %v672_v10 = vpop.f32.mrb[21].mxu0  ;;  %1073 = vmatmul.mubr.f32.gmra.mrb[16].mxu1 %v881_v4  ;;  %v883_v14 = vmax.f32 %v665_v0, %v819_v5 }
 0x11b   : > { %v884_v11 = vmax.f32 %v667_v3, %v820_v7  ;;  %v673_v12 = vadd.f32 %v672_v10, %v3268_v6 }
 0x11c   : > { %v821_v15 = vmul.f32 0.01, %v671_v9 }
 0x11d   : > { %v822_v16 = vmul.f32 0.01, %v673_v12  ;;  %v676_v17 = vpop.f32.mrb[22].mxu0  ;;  %1077 = vmatprep.mubr.f32.mxu1 %v884_v11 }
 0x11e   : > { %v677_v18 = vadd.f32 %v676_v17, %v3266_v33  ;;  %v678_v19 = vpop.f32.mrb[23].mxu0  ;;  %1078 = vmatmul.mubr.f32.gmra.mrb[18].mxu1 %v883_v14  ;;  %v885_v21 = vmax.f32 %v671_v9, %v821_v15 }
 0x11f   : > { %v886_v20 = vmax.f32 %v673_v12, %v822_v16  ;;  %v679_v13 = vadd.f32 %v678_v19, %v3268_v6 }
 0x120   : > { %v823_v22 = vmul.f32 0.01, %v677_v18 }
 0x121   : > { %v824_v23 = vmul.f32 0.01, %v679_v13  ;;  %v682_v24 = vpop.f32.mrb[24].mxu0  ;;  %1082 = vmatprep.mubr.f32.mxu1 %v886_v20 }
 0x122   : > { %v683_v25 = vadd.f32 %v682_v24, %v3266_v33  ;;  %v684_v26 = vpop.f32.mrb[25].mxu0  ;;  %1083 = vmatmul.mubr.f32.gmra.mrb[20].mxu1 %v885_v21  ;;  %v887_v32 = vmax.f32 %v677_v18, %v823_v22 }
 0x123   : > { %v888_v27 = vmax.f32 %v679_v13, %v824_v23  ;;  %v685_v31 = vadd.f32 %v684_v26, %v3268_v6 }
 0x124   : > { %v825_v34 = vmul.f32 0.01, %v683_v25 }
 0x125   : > { %v826_v35 = vmul.f32 0.01, %v685_v31  ;;  %v688_v36 = vpop.f32.mrb[26].mxu0  ;;  %1087 = vmatprep.mubr.f32.mxu1 %v888_v27 }
 0x126   : > { %v689_v37 = vadd.f32 %v688_v36, %v3266_v33  ;;  %v690_v38 = vpop.f32.mrb[27].mxu0  ;;  %1088 = vmatmul.mubr.f32.gmra.mrb[22].mxu1 %v887_v32  ;;  %v889_v41 = vmax.f32 %v683_v25, %v825_v34 }
 0x127   : > { %v890_v39 = vmax.f32 %v685_v31, %v826_v35  ;;  %v691_v40 = vadd.f32 %v690_v38, %v3268_v6 }
 0x128   : > { %v827_v42 = vmul.f32 0.01, %v689_v37 }
 0x129   : > { %v828_v43 = vmul.f32 0.01, %v691_v40  ;;  %v694_v44 = vpop.f32.mrb[28].mxu0  ;;  %1092 = vmatprep.mubr.f32.mxu1 %v890_v39 }
 0x12a   : > { %v695_v45 = vadd.f32 %v694_v44, %v3266_v33  ;;  %v696_v46 = vpop.f32.mrb[29].mxu0  ;;  %1093 = vmatmul.mubr.f32.gmra.mrb[24].mxu1 %v889_v41  ;;  %v891_v49 = vmax.f32 %v689_v37, %v827_v42 }
 0x12b   : > { %v892_v47 = vmax.f32 %v691_v40, %v828_v43  ;;  %v697_v48 = vadd.f32 %v696_v46, %v3268_v6 }
 0x12c   : > { %v829_v50 = vmul.f32 0.01, %v695_v45 }
 0x12d   : > { %v830_v51 = vmul.f32 0.01, %v697_v48  ;;  %v700_v52 = vpop.f32.mrb[30].mxu0  ;;  %1097 = vmatprep.mubr.f32.mxu1 %v892_v47 }
 0x12e   : > { %v701_v53 = vadd.f32 %v700_v52, %v3266_v33  ;;  %v702_v54 = vpop.f32.mrb[31].mxu0  ;;  %1098 = vmatmul.mubr.f32.gmra.mrb[26].mxu1 %v891_v49  ;;  %v893_v57 = vmax.f32 %v695_v45, %v829_v50 }
 0x12f   : > { %v894_v55 = vmax.f32 %v697_v48, %v830_v51  ;;  %v703_v56 = vadd.f32 %v702_v54, %v3268_v6 }
 0x130   : > { %v831_v58 = vmul.f32 0.01, %v701_v53 }
 0x131   : > { %v832_v59 = vmul.f32 0.01, %v703_v56  ;;  %v706_v60 = vpop.f32.mrb[32].mxu0  ;;  %1102 = vmatprep.mubr.f32.mxu1 %v894_v55 }
 0x132   : > { %v707_v61 = vadd.f32 %v706_v60, %v3266_v33  ;;  %v708_v62 = vpop.f32.mrb[33].mxu0  ;;  %1103 = vmatmul.mubr.f32.gmra.mrb[28].mxu1 %v893_v57  ;;  %v895_v1 = vmax.f32 %v701_v53, %v831_v58  ;;  %v1269_v58 = vld [vmem:[%s3676_s5 + $0x60] sm:$0xff] }
 0x133   : > { %v896_v63 = vmax.f32 %v703_v56, %v832_v59  ;;  %v709_v0 = vadd.f32 %v708_v62, %v3268_v6  ;;  %v1270_v59 = vld [vmem:[%s3676_s5 + $0x68] sm:$0xff] }
 0x134   : > { %v833_v2 = vmul.f32 0.01, %v707_v61  ;;  %v2718_v62 = vpack.c.bf16 %v1270_v59, %v1269_v58 }
 0x135   : > { %v834_v3 = vmul.f32 0.01, %v709_v0  ;;  %v712_v4 = vpop.f32.mrb[34].mxu0  ;;  %1107 = vmatprep.mubr.f32.mxu1 %v896_v63 }
 0x136   : > { %v713_v5 = vadd.f32 %v712_v4, %v3266_v33  ;;  %v714_v7 = vpop.f32.mrb[35].mxu0  ;;  %1108 = vmatmul.mubr.f32.gmra.mrb[30].mxu1 %v895_v1  ;;  %v897_v10 = vmax.f32 %v707_v61, %v833_v2  ;;  %2719 = vmatprep.subr.bf16.mxu0 %v2718_v62 }
 0x137   : > { %v898_v8 = vmax.f32 %v709_v0, %v834_v3  ;;  %v715_v9 = vadd.f32 %v714_v7, %v3268_v6  ;;  %2721 = vmatpush3.bf16.msra.mxu0 %v2718_v62  ;;  %v1272_v7 = vld [vmem:[%s3676_s5 + $0x78] sm:$0xff] }
 0x138   : > { %v835_v11 = vmul.f32 0.01, %v713_v5 }
 0x139   : > { %v836_v12 = vmul.f32 0.01, %v715_v9  ;;  %v718_v14 = vpop.f32.mrb[36].mxu0  ;;  %1112 = vmatprep.mubr.f32.mxu1 %v898_v8 }
 0x13a   : > { %v719_v15 = vadd.f32 %v718_v14, %v3266_v33  ;;  %v720_v16 = vpop.f32.mrb[37].mxu0  ;;  %1113 = vmatmul.mubr.f32.gmra.mrb[32].mxu1 %v897_v10  ;;  %v899_v19 = vmax.f32 %v713_v5, %v835_v11  ;;  %v1271_v5 = vld [vmem:[%s3676_s5 + $0x70] sm:$0xff] }
 0x13b   : > { %v900_v17 = vmax.f32 %v715_v9, %v836_v12  ;;  %v721_v18 = vadd.f32 %v720_v16, %v3268_v6  ;;  %v2722_v10 = vpack.c.bf16 %v1272_v7, %v1271_v5 }
 0x13c   : > { %v837_v20 = vmul.f32 0.01, %v719_v15 }
 0x13d   : > { %v838_v13 = vmul.f32 0.01, %v721_v18  ;;  %v724_v21 = vpop.f32.mrb[38].mxu0  ;;  %1117 = vmatprep.mubr.f32.mxu1 %v900_v17  ;;  %2723 = vmatprep.subr.bf16.mxu0 %v2722_v10 }
 0x13e   : > { %v725_v22 = vadd.f32 %v724_v21, %v3266_v33  ;;  %v726_v23 = vpop.f32.mrb[39].mxu0  ;;  %1118 = vmatmul.mubr.f32.gmra.mrb[34].mxu1 %v899_v19  ;;  %v901_v26 = vmax.f32 %v719_v15, %v837_v20  ;;  %2725 = vmatpush3.bf16.msra.mxu0 %v2722_v10 }
 0x13f   : > { %v902_v24 = vmax.f32 %v721_v18, %v838_v13  ;;  %v727_v25 = vadd.f32 %v726_v23, %v3268_v6 }
 0x140   : > { %v839_v27 = vmul.f32 0.01, %v725_v22 }
 0x141   : > { %v840_v31 = vmul.f32 0.01, %v727_v25  ;;  %v730_v32 = vpop.f32.mrb[40].mxu0  ;;  %1122 = vmatprep.mubr.f32.mxu1 %v902_v24 }
 0x142   : > { %v731_v34 = vadd.f32 %v730_v32, %v3266_v33  ;;  %v732_v35 = vpop.f32.mrb[41].mxu0  ;;  %1123 = vmatmul.mubr.f32.gmra.mrb[36].mxu1 %v901_v26  ;;  %v903_v38 = vmax.f32 %v725_v22, %v839_v27 }
 0x143   : > { %v904_v36 = vmax.f32 %v727_v25, %v840_v31  ;;  %v733_v37 = vadd.f32 %v732_v35, %v3268_v6 }
 0x144   : > { %v841_v39 = vmul.f32 0.01, %v731_v34 }
 0x145   : > { %v842_v40 = vmul.f32 0.01, %v733_v37  ;;  %v736_v41 = vpop.f32.mrb[42].mxu0  ;;  %1127 = vmatprep.mubr.f32.mxu1 %v904_v36 }
 0x146   : > { %v737_v42 = vadd.f32 %v736_v41, %v3266_v33  ;;  %v738_v43 = vpop.f32.mrb[43].mxu0  ;;  %1128 = vmatmul.mubr.f32.gmra.mrb[38].mxu1 %v903_v38  ;;  %v905_v46 = vmax.f32 %v731_v34, %v841_v39 }
 0x147   : > { %v906_v44 = vmax.f32 %v733_v37, %v842_v40  ;;  %v739_v45 = vadd.f32 %v738_v43, %v3268_v6 }
 0x148   : > { %v843_v47 = vmul.f32 0.01, %v737_v42 }
 0x149   : > { %v844_v48 = vmul.f32 0.01, %v739_v45  ;;  %v742_v49 = vpop.f32.mrb[44].mxu0  ;;  %1132 = vmatprep.mubr.f32.mxu1 %v906_v44 }
 0x14a   : > { %v743_v50 = vadd.f32 %v742_v49, %v3266_v33  ;;  %v744_v51 = vpop.f32.mrb[45].mxu0  ;;  %1133 = vmatmul.mubr.f32.gmra.mrb[40].mxu1 %v905_v46  ;;  %v907_v54 = vmax.f32 %v737_v42, %v843_v47 }
 0x14b   : > { %v908_v52 = vmax.f32 %v739_v45, %v844_v48  ;;  %v745_v53 = vadd.f32 %v744_v51, %v3268_v6 }
 0x14c   : > { %v845_v55 = vmul.f32 0.01, %v743_v50 }
 0x14d   : > { %v846_v56 = vmul.f32 0.01, %v745_v53  ;;  %v748_v57 = vpop.f32.mrb[46].mxu0  ;;  %1137 = vmatprep.mubr.f32.mxu1 %v908_v52 }
 0x14e   : > { %v749_v60 = vadd.f32 %v748_v57, %v3266_v33  ;;  %v750_v61 = vpop.f32.mrb[47].mxu0  ;;  %1138 = vmatmul.mubr.f32.gmra.mrb[42].mxu1 %v907_v54  ;;  %v909_v1 = vmax.f32 %v743_v50, %v845_v55 }
 0x14f   : > { %v910_v63 = vmax.f32 %v745_v53, %v846_v56  ;;  %v751_v0 = vadd.f32 %v750_v61, %v3268_v6 }
 0x150   : > { %v847_v2 = vmul.f32 0.01, %v749_v60 }
 0x151   : > { %v848_v3 = vmul.f32 0.01, %v751_v0  ;;  %v754_v4 = vpop.f32.mrb[48].mxu0  ;;  %1142 = vmatprep.mubr.f32.mxu1 %v910_v63 }
 0x152   : > { %v755_v8 = vadd.f32 %v754_v4, %v3266_v33  ;;  %v756_v9 = vpop.f32.mrb[49].mxu0  ;;  %1143 = vmatmul.mubr.f32.gmra.mrb[44].mxu1 %v909_v1  ;;  %v911_v14 = vmax.f32 %v749_v60, %v847_v2 }
 0x153   : > { %v912_v11 = vmax.f32 %v751_v0, %v848_v3  ;;  %v757_v12 = vadd.f32 %v756_v9, %v3268_v6 }
 0x154   : > { %v849_v15 = vmul.f32 0.01, %v755_v8 }
 0x155   : > { %v850_v16 = vmul.f32 0.01, %v757_v12  ;;  %v760_v17 = vpop.f32.mrb[50].mxu0  ;;  %1147 = vmatprep.mubr.f32.mxu1 %v912_v11 }
 0x156   : > { %v761_v18 = vadd.f32 %v760_v17, %v3266_v33  ;;  %v762_v19 = vpop.f32.mrb[51].mxu0  ;;  %1148 = vmatmul.mubr.f32.gmra.mrb[46].mxu1 %v911_v14  ;;  %v913_v21 = vmax.f32 %v755_v8, %v849_v15 }
 0x157   : > { %v914_v20 = vmax.f32 %v757_v12, %v850_v16  ;;  %v763_v13 = vadd.f32 %v762_v19, %v3268_v6  ;;  %v3385_v16 = vld [vmem:[%s3675_s4] ss:$0 sm:$0xff] }
 0x158   : > { %v851_v22 = vmul.f32 0.01, %v761_v18 }
 0x159   : > { %v852_v23 = vmul.f32 0.01, %v763_v13  ;;  %v766_v24 = vpop.f32.mrb[52].mxu0  ;;  %1152 = vmatprep.mubr.f32.mxu1 %v914_v20  ;;  %v1570_v20 = vld [vmem:[%s3678_s7 + $0x8] sm:$0xff] }
 0x15a   : > { %v767_v25 = vadd.f32 %v766_v24, %v3266_v33  ;;  %v768_v26 = vpop.f32.mrb[53].mxu0  ;;  %1153 = vmatmul.mubr.f32.gmra.mrb[48].mxu1 %v913_v21  ;;  %v915_v32 = vmax.f32 %v761_v18, %v851_v22 }
 0x15b   : > { %v916_v27 = vmax.f32 %v763_v13, %v852_v23  ;;  %v769_v31 = vadd.f32 %v768_v26, %v3268_v6  ;;  %v1571_v13 = vld [vmem:[%s3678_s7 + $0x10] sm:$0xff]  ;;  %v1572_v23 = vld [vmem:[%s3678_s7 + $0x18] sm:$0xff] }
 0x15c   : > { %v853_v34 = vmul.f32 0.01, %v767_v25 }
 0x15d   : > { %v854_v35 = vmul.f32 0.01, %v769_v31  ;;  %v772_v36 = vpop.f32.mrb[54].mxu0  ;;  %1157 = vmatprep.mubr.f32.mxu1 %v916_v27  ;;  %v2730_v27 = vpack.c.bf16 %v1572_v23, %v1571_v13 }
 0x15e   : > { %v773_v37 = vadd.f32 %v772_v36, %v3266_v33  ;;  %v774_v38 = vpop.f32.mrb[55].mxu0  ;;  %1158 = vmatmul.mubr.f32.gmra.mrb[50].mxu1 %v915_v32  ;;  %v917_v41 = vmax.f32 %v767_v25, %v853_v34  ;;  %v1574_v32 = vld [vmem:[%s3678_s7 + $0x28] sm:$0xff] }
 0x15f   : > { %v918_v39 = vmax.f32 %v769_v31, %v854_v35  ;;  %v775_v40 = vadd.f32 %v774_v38, %v3268_v6  ;;  %v1573_v31 = vld [vmem:[%s3678_s7 + $0x20] sm:$0xff] }
 0x160   : > { %v855_v42 = vmul.f32 0.01, %v773_v37  ;;  %v2734_v36 = vpack.c.bf16 %v1574_v32, %v1573_v31 }
 0x161   : > { %v856_v43 = vmul.f32 0.01, %v775_v40  ;;  %v778_v44 = vpop.f32.mrb[56].mxu0  ;;  %1162 = vmatprep.mubr.f32.mxu1 %v918_v39 }
 0x162   : > { %v779_v45 = vadd.f32 %v778_v44, %v3266_v33  ;;  %v780_v46 = vpop.f32.mrb[57].mxu0  ;;  %1163 = vmatmul.mubr.f32.gmra.mrb[52].mxu1 %v917_v41  ;;  %v919_v49 = vmax.f32 %v773_v37, %v855_v42 }
 0x163   : > { %v920_v47 = vmax.f32 %v775_v40, %v856_v43  ;;  %v781_v48 = vadd.f32 %v780_v46, %v3268_v6 }
 0x164   : > { %v857_v50 = vmul.f32 0.01, %v779_v45 }
 0x165   : > { %v858_v51 = vmul.f32 0.01, %v781_v48  ;;  %v784_v52 = vpop.f32.mrb[58].mxu0  ;;  %1167 = vmatprep.mubr.f32.mxu1 %v920_v47 }
 0x166   : > { %v785_v53 = vadd.f32 %v784_v52, %v3266_v33  ;;  %v786_v54 = vpop.f32.mrb[59].mxu0  ;;  %1168 = vmatmul.mubr.f32.gmra.mrb[54].mxu1 %v919_v49  ;;  %v921_v57 = vmax.f32 %v779_v45, %v857_v50 }
 0x167   : > { %v922_v55 = vmax.f32 %v781_v48, %v858_v51  ;;  %v787_v56 = vadd.f32 %v786_v54, %v3268_v6 }
 0x168   : > { %v859_v58 = vmul.f32 0.01, %v785_v53 }
 0x169   : > { %v860_v59 = vmul.f32 0.01, %v787_v56  ;;  %v790_v60 = vpop.f32.mrb[60].mxu0  ;;  %1172 = vmatprep.mubr.f32.mxu1 %v922_v55 }
 0x16a   : > { %v791_v61 = vadd.f32 %v790_v60, %v3266_v33  ;;  %v792_v62 = vpop.f32.mrb[61].mxu0  ;;  %1173 = vmatmul.mubr.f32.gmra.mrb[56].mxu1 %v921_v57  ;;  %v923_v1 = vmax.f32 %v785_v53, %v859_v58 }
 0x16b   : > { %v924_v63 = vmax.f32 %v787_v56, %v860_v59  ;;  %v793_v0 = vadd.f32 %v792_v62, %v3268_v6 }
 0x16c   : > { %v861_v2 = vmul.f32 0.01, %v791_v61 }
 0x16d   : > { %v862_v3 = vmul.f32 0.01, %v793_v0  ;;  %v796_v4 = vpop.f32.mrb[62].mxu0  ;;  %1177 = vmatprep.mubr.f32.mxu1 %v924_v63 }
 0x16e   : > { %v797_v5 = vadd.f32 %v796_v4, %v3266_v33  ;;  %v798_v7 = vpop.f32.mrb[63].mxu0  ;;  %1178 = vmatmul.mubr.f32.gmra.mrb[58].mxu1 %v923_v1  ;;  %v925_v10 = vmax.f32 %v791_v61, %v861_v2 }
 0x16f   : > { %v926_v8 = vmax.f32 %v793_v0, %v862_v3  ;;  %v799_v9 = vadd.f32 %v798_v7, %v3268_v6  ;;  %v1569_v6 = vld [vmem:[%s3678_s7] sm:$0xff] }
 0x170   : > { %v863_v11 = vmul.f32 0.01, %v797_v5  ;;  %v2726_v22 = vpack.c.bf16 %v1570_v20, %v1569_v6 }
 0x171   : > { %v864_v12 = vmul.f32 0.01, %v799_v9  ;;  %1182 = vmatprep.mubr.f32.mxu1 %v926_v8 }
 0x172   : > { %1183 = vmatmul.mubr.f32.gmra.mrb[60].mxu1 %v925_v10  ;;  %v927_v15 = vmax.f32 %v797_v5, %v863_v11  ;;  %2727 = vmatprep.subr.bf16.mxu1 %v2726_v22 }
 0x173   : > { %v928_v14 = vmax.f32 %v799_v9, %v864_v12  ;;  %2729 = vmatpush3.bf16.msra.mxu1 %v2726_v22 }
 0x174   : > { %2731 = vmatprep.subr.bf16.mxu1 %v2730_v27 }
 0x175   : > { %1187 = vmatprep.mubr.f32.mxu1 %v928_v14 }
 0x176   : > { %1188 = vmatmul.mubr.f32.gmra.mrb[62].mxu1 %v927_v15 }
 0x177   : > { %2733 = vmatpush3.bf16.msra.mxu1 %v2730_v27 }
 0x178   : > { %2735 = vmatprep.subr.bf16.mxu1 %v2734_v36 }
 0x17b   : > { %2737 = vmatpush3.bf16.msra.mxu1 %v2734_v36 }
 0x1cd   : > { %v1034_v33 = vpop.f32.mrb[0].mxu1 }
 0x1ce   : > { %v1035_v17 = vadd.f32 %v3385_v16, %v1034_v33  ;;  %v1036_v18 = vpop.f32.mrb[1].mxu1 }
 0x1d0   : > { %v1193_v19 = vmul.f32 0.01, %v1035_v17 }
 0x1d1   : > { %v1039_v21 = vpop.f32.mrb[2].mxu1 }
 0x1d2   : > { %v1225_v24 = vmax.f32 %v1035_v17, %v1193_v19  ;;  %v1040_v25 = vadd.f32 %v3385_v16, %v1039_v21  ;;  %v1041_v26 = vpop.f32.mrb[3].mxu1 }
 0x1d4   : > { %v1194_v34 = vmul.f32 0.01, %v1040_v25  ;;  %2530 = vmatprep.mubr.f32.mxu0 %v1225_v24 }
 0x1d5   : > { %v1044_v35 = vpop.f32.mrb[4].mxu1 }
 0x1d6   : > { %v1226_v37 = vmax.f32 %v1040_v25, %v1194_v34  ;;  %v1045_v38 = vadd.f32 %v3385_v16, %v1044_v35  ;;  %v1046_v39 = vpop.f32.mrb[5].mxu1 }
 0x1d8   : > { %v1195_v40 = vmul.f32 0.01, %v1045_v38  ;;  %2531 = vmatmul.mubr.f32.vlgmr.msra.gmra.mrb[64].mxu0 %v1226_v37 }
 0x1d9   : > { %v1049_v41 = vpop.f32.mrb[6].mxu1 }
 0x1da   : > { %v1227_v42 = vmax.f32 %v1045_v38, %v1195_v40  ;;  %v1050_v43 = vadd.f32 %v3385_v16, %v1049_v41  ;;  %v1051_v44 = vpop.f32.mrb[7].mxu1 }
 0x1dc   : > { %v1196_v45 = vmul.f32 0.01, %v1050_v43  ;;  %2533 = vmatprep.mubr.f32.mxu0 %v1227_v42 }
 0x1dd   : > { %v1054_v46 = vpop.f32.mrb[8].mxu1 }
 0x1de   : > { %v1228_v47 = vmax.f32 %v1050_v43, %v1196_v45  ;;  %v1055_v48 = vadd.f32 %v3385_v16, %v1054_v46  ;;  %v1056_v49 = vpop.f32.mrb[9].mxu1 }
 0x1e0   : > { %v1197_v50 = vmul.f32 0.01, %v1055_v48  ;;  %2534 = vmatmul.mubr.f32.gmra.mrb[66].mxu0 %v1228_v47 }
 0x1e1   : > { %v1059_v51 = vpop.f32.mrb[10].mxu1 }
 0x1e2   : > { %v1229_v52 = vmax.f32 %v1055_v48, %v1197_v50  ;;  %v1060_v53 = vadd.f32 %v3385_v16, %v1059_v51  ;;  %v1061_v54 = vpop.f32.mrb[11].mxu1 }
 0x1e4   : > { %v1198_v55 = vmul.f32 0.01, %v1060_v53  ;;  %2536 = vmatprep.mubr.f32.mxu0 %v1229_v52 }
 0x1e5   : > { %v1064_v56 = vpop.f32.mrb[12].mxu1 }
 0x1e6   : > { %v1230_v57 = vmax.f32 %v1060_v53, %v1198_v55  ;;  %v1065_v58 = vadd.f32 %v3385_v16, %v1064_v56  ;;  %v1066_v59 = vpop.f32.mrb[13].mxu1 }
 0x1e8   : > { %v1199_v60 = vmul.f32 0.01, %v1065_v58  ;;  %2537 = vmatmul.mubr.f32.gmra.mrb[68].mxu0 %v1230_v57 }
 0x1e9   : > { %v1069_v61 = vpop.f32.mrb[14].mxu1 }
 0x1ea   : > { %v1231_v62 = vmax.f32 %v1065_v58, %v1199_v60  ;;  %v1070_v63 = vadd.f32 %v3385_v16, %v1069_v61  ;;  %v1071_v0 = vpop.f32.mrb[15].mxu1 }
 0x1ec   : > { %v1200_v1 = vmul.f32 0.01, %v1070_v63  ;;  %2539 = vmatprep.mubr.f32.mxu0 %v1231_v62 }
 0x1ed   : > { %v1074_v2 = vpop.f32.mrb[16].mxu1 }
 0x1ee   : > { %v1232_v3 = vmax.f32 %v1070_v63, %v1200_v1  ;;  %v1075_v4 = vadd.f32 %v3385_v16, %v1074_v2  ;;  %v1076_v5 = vpop.f32.mrb[17].mxu1 }
 0x1f0   : > { %v1201_v7 = vmul.f32 0.01, %v1075_v4  ;;  %2540 = vmatmul.mubr.f32.gmra.mrb[70].mxu0 %v1232_v3 }
 0x1f1   : > { %v1079_v8 = vpop.f32.mrb[18].mxu1 }
 0x1f2   : > { %v1233_v9 = vmax.f32 %v1075_v4, %v1201_v7  ;;  %v1080_v10 = vadd.f32 %v3385_v16, %v1079_v8  ;;  %v1081_v11 = vpop.f32.mrb[19].mxu1 }
 0x1f4   : > { %v1202_v12 = vmul.f32 0.01, %v1080_v10  ;;  %2542 = vmatprep.mubr.f32.mxu0 %v1233_v9 }
 0x1f5   : > { %v1084_v14 = vpop.f32.mrb[20].mxu1 }
 0x1f6   : > { %v1234_v15 = vmax.f32 %v1080_v10, %v1202_v12  ;;  %v1085_v33 = vadd.f32 %v3385_v16, %v1084_v14  ;;  %v1086_v17 = vpop.f32.mrb[21].mxu1 }
 0x1f8   : > { %v1203_v18 = vmul.f32 0.01, %v1085_v33  ;;  %2543 = vmatmul.mubr.f32.gmra.mrb[72].mxu0 %v1234_v15 }
 0x1f9   : > { %v1089_v19 = vpop.f32.mrb[22].mxu1 }
 0x1fa   : > { %v1235_v6 = vmax.f32 %v1085_v33, %v1203_v18  ;;  %v1090_v20 = vadd.f32 %v3385_v16, %v1089_v19  ;;  %v1091_v13 = vpop.f32.mrb[23].mxu1 }
 0x1fc   : > { %v1204_v21 = vmul.f32 0.01, %v1090_v20  ;;  %2545 = vmatprep.mubr.f32.mxu0 %v1235_v6 }
 0x1fd   : > { %v1094_v22 = vpop.f32.mrb[24].mxu1 }
 0x1fe   : > { %v1236_v23 = vmax.f32 %v1090_v20, %v1204_v21  ;;  %v1095_v24 = vadd.f32 %v3385_v16, %v1094_v22  ;;  %v1096_v25 = vpop.f32.mrb[25].mxu1 }
 0x200   : > { %v1205_v26 = vmul.f32 0.01, %v1095_v24  ;;  %2546 = vmatmul.mubr.f32.gmra.mrb[74].mxu0 %v1236_v23  ;;  %v1575_v23 = vld [vmem:[%s3678_s7 + $0x30] sm:$0xff] }
 0x201   : > { %v1099_v27 = vpop.f32.mrb[26].mxu1 }
 0x202   : > { %v1237_v31 = vmax.f32 %v1095_v24, %v1205_v26  ;;  %v1100_v32 = vadd.f32 %v3385_v16, %v1099_v27  ;;  %v1101_v34 = vpop.f32.mrb[27].mxu1  ;;  %v1576_v24 = vld [vmem:[%s3678_s7 + $0x38] sm:$0xff] }
 0x204   : > { %v1206_v35 = vmul.f32 0.01, %v1100_v32  ;;  %2548 = vmatprep.mubr.f32.mxu0 %v1237_v31  ;;  %v2738_v31 = vpack.c.bf16 %v1576_v24, %v1575_v23 }
 0x205   : > { %v1104_v36 = vpop.f32.mrb[28].mxu1 }
 0x206   : > { %v1238_v37 = vmax.f32 %v1100_v32, %v1206_v35  ;;  %v1105_v38 = vadd.f32 %v3385_v16, %v1104_v36  ;;  %v1106_v39 = vpop.f32.mrb[29].mxu1  ;;  %2739 = vmatprep.subr.bf16.mxu1 %v2738_v31 }
 0x207   : > { %2741 = vmatpush3.bf16.msra.mxu1 %v2738_v31 }
 0x208   : > { %v1207_v40 = vmul.f32 0.01, %v1105_v38  ;;  %2549 = vmatmul.mubr.f32.gmra.mrb[76].mxu0 %v1238_v37 }
 0x209   : > { %v1109_v41 = vpop.f32.mrb[30].mxu1 }
 0x20a   : > { %v1239_v42 = vmax.f32 %v1105_v38, %v1207_v40  ;;  %v1110_v43 = vadd.f32 %v3385_v16, %v1109_v41  ;;  %v1111_v44 = vpop.f32.mrb[31].mxu1 }
 0x20c   : > { %v1208_v45 = vmul.f32 0.01, %v1110_v43  ;;  %2551 = vmatprep.mubr.f32.mxu0 %v1239_v42 }
 0x20d   : > { %v1114_v46 = vpop.f32.mrb[32].mxu1 }
 0x20e   : > { %v1240_v47 = vmax.f32 %v1110_v43, %v1208_v45  ;;  %v1115_v48 = vadd.f32 %v3385_v16, %v1114_v46  ;;  %v1116_v49 = vpop.f32.mrb[33].mxu1 }
 0x210   : > { %v1209_v50 = vmul.f32 0.01, %v1115_v48  ;;  %2552 = vmatmul.mubr.f32.gmra.mrb[78].mxu0 %v1240_v47 }
 0x211   : > { %v1119_v51 = vpop.f32.mrb[34].mxu1 }
 0x212   : > { %v1241_v52 = vmax.f32 %v1115_v48, %v1209_v50  ;;  %v1120_v53 = vadd.f32 %v3385_v16, %v1119_v51  ;;  %v1121_v54 = vpop.f32.mrb[35].mxu1 }
 0x214   : > { %v1210_v55 = vmul.f32 0.01, %v1120_v53  ;;  %2554 = vmatprep.mubr.f32.mxu0 %v1241_v52 }
 0x215   : > { %v1124_v56 = vpop.f32.mrb[36].mxu1 }
 0x216   : > { %v1242_v57 = vmax.f32 %v1120_v53, %v1210_v55  ;;  %v1125_v58 = vadd.f32 %v3385_v16, %v1124_v56  ;;  %v1126_v59 = vpop.f32.mrb[37].mxu1 }
 0x218   : > { %v1211_v60 = vmul.f32 0.01, %v1125_v58  ;;  %2555 = vmatmul.mubr.f32.gmra.mrb[80].mxu0 %v1242_v57 }
 0x219   : > { %v1129_v61 = vpop.f32.mrb[38].mxu1 }
 0x21a   : > { %v1243_v62 = vmax.f32 %v1125_v58, %v1211_v60  ;;  %v1130_v63 = vadd.f32 %v3385_v16, %v1129_v61  ;;  %v1131_v0 = vpop.f32.mrb[39].mxu1 }
 0x21c   : > { %v1212_v1 = vmul.f32 0.01, %v1130_v63  ;;  %2557 = vmatprep.mubr.f32.mxu0 %v1243_v62 }
 0x21d   : > { %v1134_v2 = vpop.f32.mrb[40].mxu1 }
 0x21e   : > { %v1244_v3 = vmax.f32 %v1130_v63, %v1212_v1  ;;  %v1135_v4 = vadd.f32 %v3385_v16, %v1134_v2  ;;  %v1136_v5 = vpop.f32.mrb[41].mxu1 }
 0x220   : > { %v1213_v7 = vmul.f32 0.01, %v1135_v4  ;;  %2558 = vmatmul.mubr.f32.gmra.mrb[82].mxu0 %v1244_v3 }
 0x221   : > { %v1139_v8 = vpop.f32.mrb[42].mxu1 }
 0x222   : > { %v1245_v9 = vmax.f32 %v1135_v4, %v1213_v7  ;;  %v1140_v10 = vadd.f32 %v3385_v16, %v1139_v8  ;;  %v1141_v11 = vpop.f32.mrb[43].mxu1  ;;  %v3446_v7 = vld [vmem:[%s3677_s6] ss:$0 sm:$0xff] }
 0x224   : > { %v1214_v12 = vmul.f32 0.01, %v1140_v10  ;;  %2560 = vmatprep.mubr.f32.mxu0 %v1245_v9 }
 0x225   : > { %v1144_v14 = vpop.f32.mrb[44].mxu1 }
 0x226   : > { %v1246_v15 = vmax.f32 %v1140_v10, %v1214_v12  ;;  %v1145_v33 = vadd.f32 %v3385_v16, %v1144_v14  ;;  %v1146_v17 = vpop.f32.mrb[45].mxu1 }
 0x228   : > { %v1215_v18 = vmul.f32 0.01, %v1145_v33  ;;  %2561 = vmatmul.mubr.f32.gmra.mrb[84].mxu0 %v1246_v15 }
 0x229   : > { %v1149_v19 = vpop.f32.mrb[46].mxu1 }
 0x22a   : > { %v1247_v6 = vmax.f32 %v1145_v33, %v1215_v18  ;;  %v1150_v20 = vadd.f32 %v3385_v16, %v1149_v19  ;;  %v1151_v13 = vpop.f32.mrb[47].mxu1 }
 0x22c   : > { %v1216_v21 = vmul.f32 0.01, %v1150_v20  ;;  %2563 = vmatprep.mubr.f32.mxu0 %v1247_v6 }
 0x22d   : > { %v1154_v22 = vpop.f32.mrb[48].mxu1 }
 0x22e   : > { %v1248_v25 = vmax.f32 %v1150_v20, %v1216_v21  ;;  %v1155_v26 = vadd.f32 %v3385_v16, %v1154_v22  ;;  %v1156_v27 = vpop.f32.mrb[49].mxu1 }
 0x230   : > { %v1217_v32 = vmul.f32 0.01, %v1155_v26  ;;  %2564 = vmatmul.mubr.f32.gmra.mrb[86].mxu0 %v1248_v25 }
 0x231   : > { %v1159_v34 = vpop.f32.mrb[50].mxu1 }
 0x232   : > { %v1249_v35 = vmax.f32 %v1155_v26, %v1217_v32  ;;  %v1160_v36 = vadd.f32 %v3385_v16, %v1159_v34  ;;  %v1161_v37 = vpop.f32.mrb[51].mxu1 }
 0x234   : > { %v1218_v38 = vmul.f32 0.01, %v1160_v36  ;;  %2566 = vmatprep.mubr.f32.mxu0 %v1249_v35 }
 0x235   : > { %v1164_v39 = vpop.f32.mrb[52].mxu1 }
 0x236   : > { %v1250_v40 = vmax.f32 %v1160_v36, %v1218_v38  ;;  %v1165_v41 = vadd.f32 %v3385_v16, %v1164_v39  ;;  %v1166_v42 = vpop.f32.mrb[53].mxu1 }
 0x238   : > { %v1219_v43 = vmul.f32 0.01, %v1165_v41  ;;  %2567 = vmatmul.mubr.f32.gmra.mrb[88].mxu0 %v1250_v40 }
 0x239   : > { %v1169_v44 = vpop.f32.mrb[54].mxu1 }
 0x23a   : > { %v1251_v45 = vmax.f32 %v1165_v41, %v1219_v43  ;;  %v1170_v46 = vadd.f32 %v3385_v16, %v1169_v44  ;;  %v1171_v47 = vpop.f32.mrb[55].mxu1 }
 0x23c   : > { %v1220_v48 = vmul.f32 0.01, %v1170_v46  ;;  %2569 = vmatprep.mubr.f32.mxu0 %v1251_v45 }
 0x23d   : > { %v1174_v49 = vpop.f32.mrb[56].mxu1 }
 0x23e   : > { %v1252_v50 = vmax.f32 %v1170_v46, %v1220_v48  ;;  %v1175_v51 = vadd.f32 %v3385_v16, %v1174_v49  ;;  %v1176_v52 = vpop.f32.mrb[57].mxu1 }
 0x240   : > { %v1221_v53 = vmul.f32 0.01, %v1175_v51  ;;  %2570 = vmatmul.mubr.f32.gmra.mrb[90].mxu0 %v1252_v50 }
 0x241   : > { %v1179_v54 = vpop.f32.mrb[58].mxu1 }
 0x242   : > { %v1253_v55 = vmax.f32 %v1175_v51, %v1221_v53  ;;  %v1180_v56 = vadd.f32 %v3385_v16, %v1179_v54  ;;  %v1181_v57 = vpop.f32.mrb[59].mxu1 }
 0x244   : > { %v1222_v58 = vmul.f32 0.01, %v1180_v56  ;;  %2572 = vmatprep.mubr.f32.mxu0 %v1253_v55 }
 0x245   : > { %v1184_v59 = vpop.f32.mrb[60].mxu1 }
 0x246   : > { %v1254_v60 = vmax.f32 %v1180_v56, %v1222_v58  ;;  %v1185_v61 = vadd.f32 %v3385_v16, %v1184_v59  ;;  %v1186_v62 = vpop.f32.mrb[61].mxu1 }
 0x248   : > { %v1223_v63 = vmul.f32 0.01, %v1185_v61  ;;  %2573 = vmatmul.mubr.f32.gmra.mrb[92].mxu0 %v1254_v60 }
 0x249   : > { %v1189_v0 = vpop.f32.mrb[62].mxu1 }
 0x24a   : > { %v1255_v1 = vmax.f32 %v1185_v61, %v1223_v63  ;;  %v1190_v2 = vadd.f32 %v3385_v16, %v1189_v0  ;;  %v1191_v3 = vpop.f32.mrb[63].mxu1 }
 0x24c   : > { %v1224_v4 = vmul.f32 0.01, %v1190_v2  ;;  %2575 = vmatprep.mubr.f32.mxu0 %v1255_v1 }
 0x24e   : > { %v1256_v5 = vmax.f32 %v1190_v2, %v1224_v4 }
 0x250   : > { %2576 = vmatmul.mubr.f32.gmra.mrb[94].mxu0 %v1256_v5 }
 0x2ab   : > { %v2532_v8 = vpop.f32.mrb[64].mxu0 }
 0x2ac   : > { %v1352_v9 = vadd.f32 %v2532_v8, %v3446_v7  ;;  %v1346_v10 = vpop.f32.mrb[65].mxu0 }
 0x2ad   : > { %v1347_v11 = vadd.f32 %v3446_v7, %v1346_v10 }
 0x2ae   : > { %v1506_v12 = vmul.f32 0.01, %v1352_v9 }
 0x2af   : > { %v1505_v14 = vmul.f32 0.01, %v1347_v11 }
 0x2b0   : > { %v1538_v15 = vmax.f32 %v1352_v9, %v1506_v12 }
 0x2b1   : > { %v1537_v16 = vmax.f32 %v1347_v11, %v1505_v14 }
 0x2b3   : > { %v2535_v33 = vpop.f32.mrb[66].mxu0  ;;  %2594 = vmatprep.mubr.msk.f32.mxu1 %vm1584_vm2, %v1537_v16 }
 0x2b4   : > { %v1362_v17 = vadd.f32 %v2535_v33, %v3446_v7  ;;  %v1356_v18 = vpop.f32.mrb[67].mxu0  ;;  %2595 = vmatmul.mubr.msk.f32.vlgmr.msra.gmra.mrb[64].mxu1 %vm1584_vm2, %v1538_v15 }
 0x2b5   : > { %v1357_v19 = vadd.f32 %v3446_v7, %v1356_v18 }
 0x2b6   : > { %v1508_v6 = vmul.f32 0.01, %v1362_v17 }
 0x2b7   : > { %v1507_v20 = vmul.f32 0.01, %v1357_v19 }
 0x2b8   : > { %v1540_v21 = vmax.f32 %v1362_v17, %v1508_v6 }
 0x2b9   : > { %v1539_v13 = vmax.f32 %v1357_v19, %v1507_v20 }
 0x2bb   : > { %v2538_v22 = vpop.f32.mrb[68].mxu0  ;;  %2597 = vmatprep.mubr.msk.f32.mxu1 %vm1584_vm2, %v1539_v13 }
 0x2bc   : > { %v1372_v23 = vadd.f32 %v2538_v22, %v3446_v7  ;;  %v1366_v24 = vpop.f32.mrb[69].mxu0  ;;  %2598 = vmatmul.mubr.msk.f32.gmra.mrb[66].mxu1 %vm1584_vm2, %v1540_v21 }
 0x2bd   : > { %v1367_v25 = vadd.f32 %v3446_v7, %v1366_v24 }
 0x2be   : > { %v1510_v26 = vmul.f32 0.01, %v1372_v23 }
 0x2bf   : > { %v1509_v27 = vmul.f32 0.01, %v1367_v25 }
 0x2c0   : > { %v1542_v32 = vmax.f32 %v1372_v23, %v1510_v26 }
 0x2c1   : > { %v1541_v31 = vmax.f32 %v1367_v25, %v1509_v27 }
 0x2c3   : > { %v2541_v34 = vpop.f32.mrb[70].mxu0  ;;  %2600 = vmatprep.mubr.msk.f32.mxu1 %vm1584_vm2, %v1541_v31 }
 0x2c4   : > { %v1382_v35 = vadd.f32 %v2541_v34, %v3446_v7  ;;  %v1376_v36 = vpop.f32.mrb[71].mxu0  ;;  %2601 = vmatmul.mubr.msk.f32.gmra.mrb[68].mxu1 %vm1584_vm2, %v1542_v32 }
 0x2c5   : > { %v1377_v37 = vadd.f32 %v3446_v7, %v1376_v36 }
 0x2c6   : > { %v1512_v38 = vmul.f32 0.01, %v1382_v35 }
 0x2c7   : > { %v1511_v39 = vmul.f32 0.01, %v1377_v37 }
 0x2c8   : > { %v1544_v41 = vmax.f32 %v1382_v35, %v1512_v38 }
 0x2c9   : > { %v1543_v40 = vmax.f32 %v1377_v37, %v1511_v39 }
 0x2cb   : > { %v2544_v42 = vpop.f32.mrb[72].mxu0  ;;  %2603 = vmatprep.mubr.msk.f32.mxu1 %vm1584_vm2, %v1543_v40 }
 0x2cc   : > { %v1392_v43 = vadd.f32 %v2544_v42, %v3446_v7  ;;  %v1386_v44 = vpop.f32.mrb[73].mxu0  ;;  %2604 = vmatmul.mubr.msk.f32.gmra.mrb[70].mxu1 %vm1584_vm2, %v1544_v41 }
 0x2cd   : > { %v1387_v45 = vadd.f32 %v3446_v7, %v1386_v44 }
 0x2ce   : > { %v1514_v46 = vmul.f32 0.01, %v1392_v43 }
 0x2cf   : > { %v1513_v47 = vmul.f32 0.01, %v1387_v45 }
 0x2d0   : > { %v1546_v49 = vmax.f32 %v1392_v43, %v1514_v46 }
 0x2d1   : > { %v1545_v48 = vmax.f32 %v1387_v45, %v1513_v47 }
 0x2d3   : > { %v2547_v50 = vpop.f32.mrb[74].mxu0  ;;  %2606 = vmatprep.mubr.msk.f32.mxu1 %vm1584_vm2, %v1545_v48 }
 0x2d4   : > { %v1402_v51 = vadd.f32 %v2547_v50, %v3446_v7  ;;  %v1396_v52 = vpop.f32.mrb[75].mxu0  ;;  %2607 = vmatmul.mubr.msk.f32.gmra.mrb[72].mxu1 %vm1584_vm2, %v1546_v49 }
 0x2d5   : > { %v1397_v53 = vadd.f32 %v3446_v7, %v1396_v52 }
 0x2d6   : > { %v1516_v54 = vmul.f32 0.01, %v1402_v51 }
 0x2d7   : > { %v1515_v55 = vmul.f32 0.01, %v1397_v53 }
 0x2d8   : > { %v1548_v57 = vmax.f32 %v1402_v51, %v1516_v54 }
 0x2d9   : > { %v1547_v56 = vmax.f32 %v1397_v53, %v1515_v55 }
 0x2db   : > { %v2550_v58 = vpop.f32.mrb[76].mxu0  ;;  %2609 = vmatprep.mubr.msk.f32.mxu1 %vm1584_vm2, %v1547_v56 }
 0x2dc   : > { %v1412_v59 = vadd.f32 %v2550_v58, %v3446_v7  ;;  %v1406_v60 = vpop.f32.mrb[77].mxu0  ;;  %2610 = vmatmul.mubr.msk.f32.gmra.mrb[74].mxu1 %vm1584_vm2, %v1548_v57 }
 0x2dd   : > { %v1407_v61 = vadd.f32 %v3446_v7, %v1406_v60 }
 0x2de   : > { %v1518_v62 = vmul.f32 0.01, %v1412_v59 }
 0x2df   : > { %v1517_v63 = vmul.f32 0.01, %v1407_v61 }
 0x2e0   : > { %v1550_v1 = vmax.f32 %v1412_v59, %v1518_v62 }
 0x2e1   : > { %v1549_v0 = vmax.f32 %v1407_v61, %v1517_v63 }
 0x2e3   : > { %v2553_v2 = vpop.f32.mrb[78].mxu0  ;;  %2612 = vmatprep.mubr.msk.f32.mxu1 %vm1584_vm2, %v1549_v0 }
 0x2e4   : > { %v1422_v3 = vadd.f32 %v2553_v2, %v3446_v7  ;;  %v1416_v4 = vpop.f32.mrb[79].mxu0  ;;  %2613 = vmatmul.mubr.msk.f32.gmra.mrb[76].mxu1 %vm1584_vm2, %v1550_v1 }
 0x2e5   : > { %v1417_v5 = vadd.f32 %v3446_v7, %v1416_v4 }
 0x2e6   : > { %v1520_v8 = vmul.f32 0.01, %v1422_v3 }
 0x2e7   : > { %v1519_v9 = vmul.f32 0.01, %v1417_v5 }
 0x2e8   : > { %v1552_v11 = vmax.f32 %v1422_v3, %v1520_v8 }
 0x2e9   : > { %v1551_v10 = vmax.f32 %v1417_v5, %v1519_v9 }
 0x2eb   : > { %v2556_v12 = vpop.f32.mrb[80].mxu0  ;;  %2615 = vmatprep.mubr.msk.f32.mxu1 %vm1584_vm2, %v1551_v10 }
 0x2ec   : > { %v1432_v14 = vadd.f32 %v2556_v12, %v3446_v7  ;;  %v1426_v16 = vpop.f32.mrb[81].mxu0  ;;  %2616 = vmatmul.mubr.msk.f32.gmra.mrb[78].mxu1 %vm1584_vm2, %v1552_v11 }
 0x2ed   : > { %v1427_v15 = vadd.f32 %v3446_v7, %v1426_v16 }
 0x2ee   : > { %v1522_v33 = vmul.f32 0.01, %v1432_v14 }
 0x2ef   : > { %v1521_v17 = vmul.f32 0.01, %v1427_v15 }
 0x2f0   : > { %v1554_v19 = vmax.f32 %v1432_v14, %v1522_v33  ;;  %v3515_v33 = vld [vmem:[%s3679_s8] ss:$0 sm:$0xff] }
 0x2f1   : > { %v1553_v18 = vmax.f32 %v1427_v15, %v1521_v17 }
 0x2f3   : > { %v2559_v6 = vpop.f32.mrb[82].mxu0  ;;  %2618 = vmatprep.mubr.msk.f32.mxu1 %vm1584_vm2, %v1553_v18 }
 0x2f4   : > { %v1442_v20 = vadd.f32 %v2559_v6, %v3446_v7  ;;  %v1436_v13 = vpop.f32.mrb[83].mxu0  ;;  %2619 = vmatmul.mubr.msk.f32.gmra.mrb[80].mxu1 %vm1584_vm2, %v1554_v19 }
 0x2f5   : > { %v1437_v21 = vadd.f32 %v3446_v7, %v1436_v13 }
 0x2f6   : > { %v1524_v22 = vmul.f32 0.01, %v1442_v20 }
 0x2f7   : > { %v1523_v23 = vmul.f32 0.01, %v1437_v21 }
 0x2f8   : > { %v1556_v25 = vmax.f32 %v1442_v20, %v1524_v22  ;;  %v3522_v20 = vld [vmem:[%s3680_s9] sm:$0x1] }
 0x2f9   : > { %v1555_v24 = vmax.f32 %v1437_v21, %v1523_v23  ;;  %2496 = vmatprep.mubr.msk.f32.mxu0 %vm1981_vm3, %v3522_v20 }
 0x2fb   : > { %v2562_v26 = vpop.f32.mrb[84].mxu0  ;;  %2621 = vmatprep.mubr.msk.f32.mxu1 %vm1584_vm2, %v1555_v24 }
 0x2fc   : > { %v1452_v27 = vadd.f32 %v2562_v26, %v3446_v7  ;;  %v1446_v31 = vpop.f32.mrb[85].mxu0  ;;  %2622 = vmatmul.mubr.msk.f32.gmra.mrb[82].mxu1 %vm1584_vm2, %v1556_v25 }
 0x2fd   : > { %v1447_v32 = vadd.f32 %v3446_v7, %v1446_v31  ;;  %v1971_v31 = vld [vmem:[#allocation2] sm:$0x1] }
 0x2fe   : > { %v1526_v34 = vmul.f32 0.01, %v1452_v27 }
 0x2ff   : > { %v1525_v35 = vmul.f32 0.01, %v1447_v32 }
 0x300   : > { %v1558_v37 = vmax.f32 %v1452_v27, %v1526_v34  ;;  %v2908_v34 = vmov 0  }
 0x301   : > { %v1557_v36 = vmax.f32 %v1447_v32, %v1525_v35  ;;  %2833 = vset.pattern.permute.xlu0 %v2908_v34 }
 0x302   : > { %1974 = vperm.xlu0 %2833, %v1971_v31  }
 0x303   : > { %v2565_v38 = vpop.f32.mrb[86].mxu0  ;;  %2624 = vmatprep.mubr.msk.f32.mxu1 %vm1584_vm2, %v1557_v36 }
 0x304   : > { %v1462_v39 = vadd.f32 %v2565_v38, %v3446_v7  ;;  %v1456_v40 = vpop.f32.mrb[87].mxu0  ;;  %2625 = vmatmul.mubr.msk.f32.gmra.mrb[84].mxu1 %vm1584_vm2, %v1558_v37 }
 0x305   : > { %v1457_v41 = vadd.f32 %v3446_v7, %v1456_v40 }
 0x306   : > { %v1528_v42 = vmul.f32 0.01, %v1462_v39 }
 0x307   : > { %v1527_v43 = vmul.f32 0.01, %v1457_v41 }
 0x308   : > { %v1560_v45 = vmax.f32 %v1462_v39, %v1528_v42 }
 0x309   : > { %v1559_v44 = vmax.f32 %v1457_v41, %v1527_v43 }
 0x30b   : > { %v2568_v46 = vpop.f32.mrb[88].mxu0  ;;  %2627 = vmatprep.mubr.msk.f32.mxu1 %vm1584_vm2, %v1559_v44 }
 0x30c   : > { %v1472_v47 = vadd.f32 %v2568_v46, %v3446_v7  ;;  %v1466_v48 = vpop.f32.mrb[89].mxu0  ;;  %2628 = vmatmul.mubr.msk.f32.gmra.mrb[86].mxu1 %vm1584_vm2, %v1560_v45 }
 0x30d   : > { %v1467_v49 = vadd.f32 %v3446_v7, %v1466_v48 }
 0x30e   : > { %v1530_v50 = vmul.f32 0.01, %v1472_v47 }
 0x30f   : > { %v1529_v51 = vmul.f32 0.01, %v1467_v49 }
 0x310   : > { %v1562_v53 = vmax.f32 %v1472_v47, %v1530_v50 }
 0x311   : > { %v1561_v52 = vmax.f32 %v1467_v49, %v1529_v51 }
 0x313   : > { %v2571_v54 = vpop.f32.mrb[90].mxu0  ;;  %2630 = vmatprep.mubr.msk.f32.mxu1 %vm1584_vm2, %v1561_v52 }
 0x314   : > { %v1482_v55 = vadd.f32 %v2571_v54, %v3446_v7  ;;  %v1476_v56 = vpop.f32.mrb[91].mxu0  ;;  %2631 = vmatmul.mubr.msk.f32.gmra.mrb[88].mxu1 %vm1584_vm2, %v1562_v53 }
 0x315   : > { %v1477_v57 = vadd.f32 %v3446_v7, %v1476_v56 }
 0x316   : > { %v1532_v58 = vmul.f32 0.01, %v1482_v55 }
 0x317   : > { %v1531_v59 = vmul.f32 0.01, %v1477_v57 }
 0x318   : > { %v1564_v61 = vmax.f32 %v1482_v55, %v1532_v58 }
 0x319   : > { %v1563_v60 = vmax.f32 %v1477_v57, %v1531_v59 }
 0x31b   : > { %v2574_v62 = vpop.f32.mrb[92].mxu0  ;;  %2633 = vmatprep.mubr.msk.f32.mxu1 %vm1584_vm2, %v1563_v60 }
 0x31c   : > { %v1492_v63 = vadd.f32 %v2574_v62, %v3446_v7  ;;  %v1486_v0 = vpop.f32.mrb[93].mxu0  ;;  %2634 = vmatmul.mubr.msk.f32.gmra.mrb[90].mxu1 %vm1584_vm2, %v1564_v61 }
 0x31d   : > { %v1487_v1 = vadd.f32 %v3446_v7, %v1486_v0 }
 0x31e   : > { %v1534_v2 = vmul.f32 0.01, %v1492_v63 }
 0x31f   : > { %v1533_v3 = vmul.f32 0.01, %v1487_v1 }
 0x320   : > { %v1566_v5 = vmax.f32 %v1492_v63, %v1534_v2 }
 0x321   : > { %v1565_v4 = vmax.f32 %v1487_v1, %v1533_v3 }
 0x323   : > { %v2577_v8 = vpop.f32.mrb[94].mxu0  ;;  %2636 = vmatprep.mubr.msk.f32.mxu1 %vm1584_vm2, %v1565_v4 }
 0x324   : > { %v1502_v9 = vadd.f32 %v2577_v8, %v3446_v7  ;;  %v1496_v10 = vpop.f32.mrb[95].mxu0  ;;  %2637 = vmatmul.mubr.msk.f32.gmra.mrb[92].mxu1 %vm1584_vm2, %v1566_v5 }
 0x325   : > { %v1497_v11 = vadd.f32 %v3446_v7, %v1496_v10 }
 0x326   : > { %v1536_v12 = vmul.f32 0.01, %v1502_v9 }
 0x327   : > { %v1535_v14 = vmul.f32 0.01, %v1497_v11 }
 0x328   : > { %v1568_v15 = vmax.f32 %v1502_v9, %v1536_v12 }
 0x329   : > { %v1567_v16 = vmax.f32 %v1497_v11, %v1535_v14 }
 0x32b   : > { %2639 = vmatprep.mubr.msk.f32.mxu1 %vm1584_vm2, %v1567_v16 }
 0x32c   : > { %2640 = vmatmul.mubr.msk.f32.gmra.mrb[94].mxu1 %vm1584_vm2, %v1568_v15 }
 0x387   : > { %v2596_v17 = vpop.f32.mrb[64].mxu1 }
 0x388   : > { %v1753_v18 = vadd.f32 %v2596_v17, %v3515_v33  ;;  %v1747_v19 = vpop.f32.mrb[65].mxu1 }
 0x389   : > { %v1748_v6 = vadd.f32 %v3515_v33, %v1747_v19 }
 0x38a   : > { %v1907_v7 = vmul.f32 0.01, %v1753_v18 }
 0x38b   : > { %v1906_v13 = vmul.f32 0.01, %v1748_v6 }
 0x38c   : > { %v1939_v21 = vmax.f32 %v1753_v18, %v1907_v7 }
 0x38d   : > { %v1938_v22 = vmax.f32 %v1748_v6, %v1906_v13 }
 0x38f   : > { %v3526_v23 = vpack.c.bf16 %v1939_v21, %v1938_v22  ;;  %v2599_v24 = vpop.f32.mrb[66].mxu1 }
 0x390   : > { %v1763_v25 = vadd.f32 %v2599_v24, %v3515_v33  ;;  %v1757_v26 = vpop.f32.mrb[67].mxu1 }
 0x391   : > { %v1758_v27 = vadd.f32 %v3515_v33, %v1757_v26 }
 0x392   : > { %v1909_v32 = vmul.f32 0.01, %v1763_v25 }
 0x393   : > { %v1908_v35 = vmul.f32 0.01, %v1758_v27 }
 0x394   : > { %v1941_v36 = vmax.f32 %v1763_v25, %v1909_v32 }
 0x395   : > { %v1940_v37 = vmax.f32 %v1758_v27, %v1908_v35 }
 0x397   : > { %v3530_v38 = vpack.c.bf16 %v1941_v36, %v1940_v37  ;;  %v2602_v39 = vpop.f32.mrb[68].mxu1 }
 0x398   : > { %v1773_v40 = vadd.f32 %v2602_v39, %v3515_v33  ;;  %v1767_v41 = vpop.f32.mrb[69].mxu1 }
 0x399   : > { %v1768_v42 = vadd.f32 %v3515_v33, %v1767_v41 }
 0x39a   : > { %v1911_v43 = vmul.f32 0.01, %v1773_v40 }
 0x39b   : > { %v1910_v44 = vmul.f32 0.01, %v1768_v42 }
 0x39c   : > { %v1943_v45 = vmax.f32 %v1773_v40, %v1911_v43 }
 0x39d   : > { %v1942_v46 = vmax.f32 %v1768_v42, %v1910_v44 }
 0x39f   : > { %v3534_v47 = vpack.c.bf16 %v1943_v45, %v1942_v46  ;;  %v2605_v48 = vpop.f32.mrb[70].mxu1 }
 0x3a0   : > { %v1783_v49 = vadd.f32 %v2605_v48, %v3515_v33  ;;  %v1777_v50 = vpop.f32.mrb[71].mxu1 }
 0x3a1   : > { %v1778_v51 = vadd.f32 %v3515_v33, %v1777_v50 }
 0x3a2   : > { %v1913_v52 = vmul.f32 0.01, %v1783_v49 }
 0x3a3   : > { %v1912_v53 = vmul.f32 0.01, %v1778_v51 }
 0x3a4   : > { %v1945_v54 = vmax.f32 %v1783_v49, %v1913_v52 }
 0x3a5   : > { %v1944_v55 = vmax.f32 %v1778_v51, %v1912_v53 }
 0x3a7   : > { %v3538_v56 = vpack.c.bf16 %v1945_v54, %v1944_v55  ;;  %v2608_v57 = vpop.f32.mrb[72].mxu1 }
 0x3a8   : > { %v1793_v58 = vadd.f32 %v2608_v57, %v3515_v33  ;;  %v1787_v59 = vpop.f32.mrb[73].mxu1 }
 0x3a9   : > { %v1788_v60 = vadd.f32 %v3515_v33, %v1787_v59 }
 0x3aa   : > { %v1915_v61 = vmul.f32 0.01, %v1793_v58 }
 0x3ab   : > { %v1914_v62 = vmul.f32 0.01, %v1788_v60 }
 0x3ac   : > { %v1947_v63 = vmax.f32 %v1793_v58, %v1915_v61 }
 0x3ad   : > { %v1946_v0 = vmax.f32 %v1788_v60, %v1914_v62 }
 0x3af   : > { %v3542_v1 = vpack.c.bf16 %v1947_v63, %v1946_v0  ;;  %v2611_v2 = vpop.f32.mrb[74].mxu1 }
 0x3b0   : > { %v1803_v3 = vadd.f32 %v2611_v2, %v3515_v33  ;;  %v1797_v4 = vpop.f32.mrb[75].mxu1 }
 0x3b1   : > { %v1798_v5 = vadd.f32 %v3515_v33, %v1797_v4 }
 0x3b2   : > { %v1917_v8 = vmul.f32 0.01, %v1803_v3 }
 0x3b3   : > { %v1916_v9 = vmul.f32 0.01, %v1798_v5 }
 0x3b4   : > { %v1949_v10 = vmax.f32 %v1803_v3, %v1917_v8 }
 0x3b5   : > { %v1948_v11 = vmax.f32 %v1798_v5, %v1916_v9 }
 0x3b7   : > { %v3546_v12 = vpack.c.bf16 %v1949_v10, %v1948_v11  ;;  %v2614_v14 = vpop.f32.mrb[76].mxu1 }
 0x3b8   : > { %v1813_v16 = vadd.f32 %v2614_v14, %v3515_v33  ;;  %v1807_v15 = vpop.f32.mrb[77].mxu1 }
 0x3b9   : > { %v1808_v17 = vadd.f32 %v3515_v33, %v1807_v15 }
 0x3ba   : > { %v1919_v18 = vmul.f32 0.01, %v1813_v16 }
 0x3bb   : > { %v1918_v19 = vmul.f32 0.01, %v1808_v17 }
 0x3bc   : > { %v1951_v6 = vmax.f32 %v1813_v16, %v1919_v18 }
 0x3bd   : > { %v1950_v7 = vmax.f32 %v1808_v17, %v1918_v19 }
 0x3bf   : > { %v3550_v13 = vpack.c.bf16 %v1951_v6, %v1950_v7  ;;  %v2617_v21 = vpop.f32.mrb[78].mxu1 }
 0x3c0   : > { %v1823_v22 = vadd.f32 %v2617_v21, %v3515_v33  ;;  %v1817_v24 = vpop.f32.mrb[79].mxu1 }
 0x3c1   : > { %v1818_v25 = vadd.f32 %v3515_v33, %v1817_v24 }
 0x3c2   : > { %v1921_v26 = vmul.f32 0.01, %v1823_v22 }
 0x3c3   : > { %v1920_v27 = vmul.f32 0.01, %v1818_v25 }
 0x3c4   : > { %v1953_v31 = vmax.f32 %v1823_v22, %v1921_v26 }
 0x3c5   : > { %v1952_v32 = vmax.f32 %v1818_v25, %v1920_v27 }
 0x3c7   : > { %v3554_v34 = vpack.c.bf16 %v1953_v31, %v1952_v32  ;;  %v2620_v35 = vpop.f32.mrb[80].mxu1 }
 0x3c8   : > { %v1833_v36 = vadd.f32 %v2620_v35, %v3515_v33  ;;  %v1827_v37 = vpop.f32.mrb[81].mxu1 }
 0x3c9   : > { %v1828_v39 = vadd.f32 %v3515_v33, %v1827_v37 }
 0x3ca   : > { %v1923_v40 = vmul.f32 0.01, %v1833_v36 }
 0x3cb   : > { %v1922_v41 = vmul.f32 0.01, %v1828_v39 }
 0x3cc   : > { %v1955_v42 = vmax.f32 %v1833_v36, %v1923_v40 }
 0x3cd   : > { %v1954_v43 = vmax.f32 %v1828_v39, %v1922_v41 }
 0x3cf   : > { %v2742_v45 = vpack.c.bf16 %v1955_v42, %v1954_v43  ;;  %v2623_v46 = vpop.f32.mrb[82].mxu1 }
 0x3d0   : > { %v1843_v48 = vadd.f32 %v2623_v46, %v3515_v33  ;;  %v1837_v49 = vpop.f32.mrb[83].mxu1 }
 0x3d1   : > { %v1838_v50 = vadd.f32 %v3515_v33, %v1837_v49  ;;  %2744 = vmatprep.subr.msk.bf16.mxu0 %vm3560_vm4, %v2742_v45 }
 0x3d2   : > { %v1925_v51 = vmul.f32 0.01, %v1843_v48  ;;  %2747 = vmatpush3.bf16.xpose.msk.msra.mxu0 %vm3560_vm4, %v3526_v23 }
 0x3d3   : > { %v1924_v52 = vmul.f32 0.01, %v1838_v50 }
 0x3d4   : > { %v1957_v53 = vmax.f32 %v1843_v48, %v1925_v51 }
 0x3d5   : > { %v1956_v54 = vmax.f32 %v1838_v50, %v1924_v52 }
 0x3d7   : > { %v2748_v55 = vpack.c.bf16 %v1957_v53, %v1956_v54  ;;  %v2626_v57 = vpop.f32.mrb[84].mxu1 }
 0x3d8   : > { %v1853_v58 = vadd.f32 %v2626_v57, %v3515_v33  ;;  %v1847_v59 = vpop.f32.mrb[85].mxu1 }
 0x3d9   : > { %v1848_v60 = vadd.f32 %v3515_v33, %v1847_v59  ;;  %2750 = vmatprep.subr.msk.bf16.mxu0 %vm3560_vm4, %v2748_v55 }
 0x3da   : > { %v1927_v61 = vmul.f32 0.01, %v1853_v58  ;;  %2753 = vmatpush3.bf16.xpose.msk.msra.mxu0 %vm3560_vm4, %v3530_v38 }
 0x3db   : > { %v1926_v62 = vmul.f32 0.01, %v1848_v60 }
 0x3dc   : > { %v1959_v23 = vmax.f32 %v1853_v58, %v1927_v61 }
 0x3dd   : > { %v1958_v63 = vmax.f32 %v1848_v60, %v1926_v62 }
 0x3df   : > { %v2754_v0 = vpack.c.bf16 %v1959_v23, %v1958_v63  ;;  %v2629_v2 = vpop.f32.mrb[86].mxu1 }
 0x3e0   : > { %v1863_v3 = vadd.f32 %v2629_v2, %v3515_v33  ;;  %v1857_v4 = vpop.f32.mrb[87].mxu1 }
 0x3e1   : > { %v1858_v5 = vadd.f32 %v3515_v33, %v1857_v4  ;;  %2756 = vmatprep.subr.msk.bf16.mxu0 %vm3560_vm4, %v2754_v0 }
 0x3e2   : > { %v1929_v8 = vmul.f32 0.01, %v1863_v3  ;;  %2759 = vmatpush3.bf16.xpose.msk.msra.mxu0 %vm3560_vm4, %v3534_v47 }
 0x3e3   : > { %v1928_v9 = vmul.f32 0.01, %v1858_v5 }
 0x3e4   : > { %v1961_v38 = vmax.f32 %v1863_v3, %v1929_v8 }
 0x3e5   : > { %v1960_v10 = vmax.f32 %v1858_v5, %v1928_v9 }
 0x3e7   : > { %v2760_v11 = vpack.c.bf16 %v1961_v38, %v1960_v10  ;;  %v2632_v14 = vpop.f32.mrb[88].mxu1 }
 0x3e8   : > { %v1873_v16 = vadd.f32 %v2632_v14, %v3515_v33  ;;  %v1867_v15 = vpop.f32.mrb[89].mxu1 }
 0x3e9   : > { %v1868_v17 = vadd.f32 %v3515_v33, %v1867_v15  ;;  %2762 = vmatprep.subr.msk.bf16.mxu0 %vm3560_vm4, %v2760_v11 }
 0x3ea   : > { %v1931_v18 = vmul.f32 0.01, %v1873_v16  ;;  %2765 = vmatpush3.bf16.xpose.msk.msra.mxu0 %vm3560_vm4, %v3538_v56 }
 0x3eb   : > { %v1930_v19 = vmul.f32 0.01, %v1868_v17 }
 0x3ec   : > { %v1963_v47 = vmax.f32 %v1873_v16, %v1931_v18 }
 0x3ed   : > { %v1962_v6 = vmax.f32 %v1868_v17, %v1930_v19 }
 0x3ef   : > { %v2766_v7 = vpack.c.bf16 %v1963_v47, %v1962_v6  ;;  %v2635_v21 = vpop.f32.mrb[90].mxu1 }
 0x3f0   : > { %v1883_v22 = vadd.f32 %v2635_v21, %v3515_v33  ;;  %v1877_v24 = vpop.f32.mrb[91].mxu1 }
 0x3f1   : > { %v1878_v25 = vadd.f32 %v3515_v33, %v1877_v24  ;;  %2768 = vmatprep.subr.msk.bf16.mxu0 %vm3560_vm4, %v2766_v7 }
 0x3f2   : > { %v1933_v26 = vmul.f32 0.01, %v1883_v22  ;;  %2771 = vmatpush3.bf16.xpose.msk.msra.mxu0 %vm3560_vm4, %v3542_v1 }
 0x3f3   : > { %v1932_v27 = vmul.f32 0.01, %v1878_v25 }
 0x3f4   : > { %v1965_v56 = vmax.f32 %v1883_v22, %v1933_v26 }
 0x3f5   : > { %v1964_v31 = vmax.f32 %v1878_v25, %v1932_v27 }
 0x3f7   : > { %v2772_v32 = vpack.c.bf16 %v1965_v56, %v1964_v31  ;;  %v2638_v35 = vpop.f32.mrb[92].mxu1 }
 0x3f8   : > { %v1893_v36 = vadd.f32 %v2638_v35, %v3515_v33  ;;  %v1887_v37 = vpop.f32.mrb[93].mxu1 }
 0x3f9   : > { %v1888_v39 = vadd.f32 %v3515_v33, %v1887_v37  ;;  %2774 = vmatprep.subr.msk.bf16.mxu0 %vm3560_vm4, %v2772_v32 }
 0x3fa   : > { %v1935_v40 = vmul.f32 0.01, %v1893_v36  ;;  %2777 = vmatpush3.bf16.xpose.msk.msra.mxu0 %vm3560_vm4, %v3546_v12 }
 0x3fb   : > { %v1934_v41 = vmul.f32 0.01, %v1888_v39 }
 0x3fc   : > { %v1967_v1 = vmax.f32 %v1893_v36, %v1935_v40 }
 0x3fd   : > { %v1966_v42 = vmax.f32 %v1888_v39, %v1934_v41 }
 0x3ff   : > { %v2778_v43 = vpack.c.bf16 %v1967_v1, %v1966_v42  ;;  %v2641_v45 = vpop.f32.mrb[94].mxu1 }
 0x400   : > { %v1903_v46 = vadd.f32 %v2641_v45, %v3515_v33  ;;  %v1897_v48 = vpop.f32.mrb[95].mxu1 }
 0x401   : > { %v1898_v49 = vadd.f32 %v3515_v33, %v1897_v48  ;;  %2780 = vmatprep.subr.msk.bf16.mxu0 %vm3560_vm4, %v2778_v43  ;;  %v1975_v33 = vpop.permute.xlu0 %1974 }
 0x402   : > { %v1937_v50 = vmul.f32 0.01, %v1903_v46  ;;  %2783 = vmatpush3.bf16.xpose.msk.msra.mxu0 %vm3560_vm4, %v3550_v13  ;;  %v1980_v54 = vrot.slane %v1975_v33, %v432_v30 }
 0x403   : > { %v1936_v51 = vmul.f32 0.01, %v1898_v49 }
 0x404   : > { %v1969_v12 = vmax.f32 %v1903_v46, %v1937_v50 }
 0x405   : > { %v1968_v52 = vmax.f32 %v1898_v49, %v1936_v51 }
 0x407   : > { %v2784_v53 = vpack.c.bf16 %v1969_v12, %v1968_v52 }
 0x409   : > { %2786 = vmatprep.subr.msk.bf16.mxu0 %vm3560_vm4, %v2784_v53 }
 0x40a   : > { %2789 = vmatpush3.bf16.xpose.msk.msra.mxu0 %vm3560_vm4, %v3554_v34 }
 0x411   : > { %2497 = vmatmul.mubr.msk.f32.vlgmr.msra.gmra.mrb[96].mxu0 %vm1981_vm3, %v3522_v20  ;;  %v2909_v20 = vmov 1966171168  }
 0x412   : > { %v2168_v30 = vunpack.c.l.s4 %v2909_v20 }
 0x414   : > { %v2169_v0 = vunpack.c.0.s8 %v2168_v30 }
 0x416   : > { %v2172_v3 = vsub.s32 %v2169_v0, %v3257_v29 }
 0x4e4   : > { %v2147_v55 = vpop.f32.mrb[96].mxu0 }
 0x4e5   : > { %v2148_v13 = vadd.f32 %v2147_v55, %v1980_v54  ;;  %v2149_v57 = vpop.f32.mrb[97].mxu0 }
 0x4e6   : > { %v2150_v58 = vadd.f32 %v2149_v57, %v1980_v54 }
 0x4e7   : > { %v2152_v59 = vsub.f32 0.0, %v2148_v13 }
 0x4e8   : > { %v2153_v60 = vsub.f32 0.0, %v2150_v58 }
 0x4e9   : > { %v2154_v61 = vmul.f32 1.442695, %v2152_v59 }
 0x4ea   : > { %v2156_v62 = vmul.f32 1.442695, %v2153_v60 }
 0x4eb   : > { %2834 = vpow2.f32 %v2154_v61 }
 0x4ec   : > { %2836 = vpow2.f32 %v2156_v62 }
 0x4f5   : > { %v2835_v44 = vpop.eup %2834 }
 0x4f6   : > { %v2837_v34 = vpop.eup %2836  ;;  %v2158_v23 = vadd.f32 1.0, %v2835_v44 }
 0x4f7   : > { %v2159_v63 = vadd.f32 1.0, %v2837_v34 }
 0x4f8   : > { %2838 = vrcp.f32 %v2158_v23 }
 0x4f9   : > { %2840 = vrcp.f32 %v2159_v63 }
 0x502   : > { %v2839_v2 = vpop.eup %2838 }
 0x503   : > { %v2841_v4 = vpop.eup %2840 }
 0x504   : > { %v2166_v5 = vcombine.low %v2839_v2, %v2841_v4 }
 0x506   : > { %v2173_v8 = vrot.slane %v2166_v5, %v2172_v3 }
 0x508   : > { %v2180_v9 = vrot.slane %v2173_v8, %v2172_v3 }
 0x50a   : > { %2186 = vst.msk [vmem:[%s382_s13] sm:$0x3] %vm2184_vm5, %v2180_v9 }
 0x50b   : > { %2855 = shalt.err (!%p2852_p3)
}
 0x50c   : > { %s2856_s17 = scalar_lea.hbm %s3629_s16, 32  ;;  %s2860_s13 = scalar_lea.hbm %s3682_s11, 64 }
 0x50d   : > { %p2857_p4 = scmp.ne.s32.totalorder %s3629_s16, %s2856_s17  ;;  %p2861_p9 = scmp.lt.u32.totalorder %s3629_s16, %s3682_s11 }
 0x50e   : > { %p2862_p10 = scmp.lt.u32.totalorder %s2860_s13, %s2856_s17  ;;  %p2864_p12 = scmp.lt.u32.totalorder %s2856_s17, %s3629_s16 }
 0x50f   : > { %p2858_p7 = pnand %p2857_p4, %p3009_p5 }
 0x510   : > { %p2863_p11 = por %p2862_p10, %p2861_p9 }
 0x511   : > { %p2859_p8 = pneg %p2858_p7 }
 0x512   : > { %p2865_p13 = por %p2864_p12, %p2863_p11 }
 0x514   : > { %p2866_p0 = pnand %p2865_p13, %p2859_p8 }
 0x516   : > { %2869 = shalt.err (!%p2866_p0)
}
 0x517   : > { %2790 = dma.vmem_to_hbm [thread:$0]  (%p3009_p5), %s3631_s14, 32, %s3629_s16, %s2188_s18  }
 0x518 PF: > { %p2796_p1 = scmp.ge.s32.totalorder %s2904_s22, 2  ;;  %s2214_s23 = sand.u32 1, %s2892_s19  }
 0x519   : > { %s2215_s25 = scalar_lea.sflag [#allocation4], %s2214_s23 }
 0x51a   : > { %p2793_p2 = pnand %p2796_p1, %p3013_p6 }
 0x51c   : > { %2887 = dma.done.wait (!%p2793_p2), %s2215_s25, 32  }
 0x51d   : > { %2889 = vsyncadd (!%p2793_p2), %s2215_s25, 4294967264  ;;  %s3688_s26 = sld [smem:[#allocation6_spill]]  ;;  %p23_p3 = scmp.ge.s32.totalorder %s2997_s24, 4  }
 0x51e   : > { %s3689_s19 = smov %s2896_s20  ;;  %s3690_s20 = smov %s2900_s21 }
 0x51f   : > { %s3692_s22 = smov %s2997_s24  ;;  %25 = sbr.rel (!%p23_p3) target bundleno = 6 (0x6), region = 99 }
 0x523   : > { %s3691_s21 = smov %s3688_s26 }
 0x526   :  { %2220 = vsyncpa [#allocation4], 1 }
 0x527   :  { %2222 = vsyncpa [#allocation4 + $0x1], 1 }

</bundles_post_ra>
